<compile_context>
chip_gen: v7x
topology: tpu7x:2x2x1
jax: 0.10.0
libtpu: 0.0.40
codegen_flags: <defaults>
</compile_context>

<pallas_src>
import functools

import jax
import jax.numpy as jnp
from jax.experimental import pallas as pl
from jax.experimental.pallas import tpu as pltpu


def _im2col_conv(x_ref, w_ref, col_ref, *, rate, H, W, Cin):
    """Dilated 3x3 conv (no bias) for the current batch tile.

    x_ref:   (1, H, W, Cin)   bf16 NHWC activation tile
    w_ref:   (Kpad, Cpad)     bf16 taps, row = (kh*3 + kw)*Cin + cin (zero-padded tail rows)
    col_ref: (1, H, W, Kpad)  bf16 VMEM im2col scratch
    returns: (H*W, Cpad)      f32 raw conv output
    """
    # Zero the im2col buffer (one dense VMEM store), then scatter each dilated tap's *valid*
    # rectangle into its channel slot.  The untouched border stays zero == the conv's
    # `padding=rate` halo, and the padded K tail stays zero so it contributes nothing.
    col_ref[...] = jnp.zeros_like(col_ref)
    for kh in range(3):
        for kw in range(3):
            dh, dw = (kh - 1) * rate, (kw - 1) * rate
            h0, h1 = max(0, -dh), min(H, H - dh)
            w0, w1 = max(0, -dw), min(W, W - dw)
            if h0 >= h1 or w0 >= w1:
                continue  # tap lies entirely in the zero halo (rate >= H or W)
            k = kh * 3 + kw
            col_ref[:, h0:h1, w0:w1, k * Cin:(k + 1) * Cin] = (
                x_ref[:, h0 + dh:h1 + dh, w0 + dw:w1 + dw, :])
    # One fat MXU contraction (K = 9*Cin, zero-padded) with f32 accumulation.
    col = col_ref[...].reshape(H * W, col_ref.shape[-1])
    return jnp.dot(col, w_ref[...], preferred_element_type=jnp.float32)


def _conv_stats_kernel(x_ref, w_ref, stat_ref, col_ref, *, rate, H, W, Cin):
    """Pass 1: conv + per-batch-tile partial BN statistics (sum / sum-of-squares)."""
    acc = _im2col_conv(x_ref, w_ref, col_ref, rate=rate, H=H, W=W, Cin=Cin)
    s = jnp.sum(acc, axis=0, keepdims=True)          # (1, Cpad)
    ss = jnp.sum(acc * acc, axis=0, keepdims=True)   # (1, Cpad)
    stat_ref[...] = jnp.concatenate([s, ss], axis=0)[None, :, :]


def _conv_norm_kernel(x_ref, w_ref, scale_ref, shift_ref, o_ref, col_ref,
                      *, rate, H, W, Cin):
    """Pass 2: conv recomputed + fused per-channel affine (BatchNorm collapsed to scale/shift)."""
    acc = _im2col_conv(x_ref, w_ref, col_ref, rate=rate, H=H, W=W, Cin=Cin)
    y = acc * scale_ref[...] + shift_ref[...]
    o_ref[...] = y.reshape(o_ref.shape).astype(o_ref.dtype)


def atrous_module_forward(x_nchw, w_oihw, bias, gamma, beta, rate, eps=1e-5):
    """Matches Atrous_module(inplanes, planes, rate).forward(x) (training-mode BN), NCHW I/O."""
    N, Cin, H, W = x_nchw.shape
    Cout = w_oihw.shape[0]
    Cpad = -(-Cout // 128) * 128          # lane-dense channels for matmul / BN / stores
    K = 9 * Cin
    Kpad = -(-K // 8) * 8                 # sublane-aligned contraction depth

    # bf16 MXU operands (accumulation stays f32); weights reshaped for the im2col dot.
    x_nhwc = jnp.transpose(x_nchw, (0, 2, 3, 1)).astype(jnp.bfloat16)        # (N, H, W, Cin)
    w_col = jnp.transpose(w_oihw, (2, 3, 1, 0)).reshape(K, Cout)             # (9*Cin, Cout)
    w_col = jnp.pad(w_col, ((0, Kpad - K), (0, Cpad - Cout))).astype(jnp.bfloat16)
    b_pad = jnp.pad(bias.astype(jnp.float32), (0, Cpad - Cout))
    g_pad = jnp.pad(gamma.astype(jnp.float32), (0, Cpad - Cout))
    beta_pad = jnp.pad(beta.astype(jnp.float32), (0, Cpad - Cout))

    kern_kwargs = dict(rate=rate, H=H, W=W, Cin=Cin)
    x_spec = pl.BlockSpec((1, H, W, Cin), lambda n: (n, 0, 0, 0))
    w_spec = pl.BlockSpec((Kpad, Cpad), lambda n: (0, 0))
    vec_spec = pl.BlockSpec((1, Cpad), lambda n: (0, 0))
    scratch = [pltpu.VMEM((1, H, W, Kpad), jnp.bfloat16)]
    cparams = pltpu.CompilerParams(
        dimension_semantics=("parallel",),      # batch tiles -> both TensorCores on v7x
        vmem_limit_bytes=32 * 1024 * 1024,      # explicit budget; tiles are tiny vs VMEM
    )
    # TODO(synk): for large H/W also tile the spatial dims (overlapping halo windows need
    # manual DMA; current tiling is per batch element).

    # Pass 1: conv + per-batch-tile partial sum / sum-of-squares (single merged stats output).
    stats = pl.pallas_call(
        functools.partial(_conv_stats_kernel, **kern_kwargs),
        out_shape=jax.ShapeDtypeStruct((N, 2, Cpad), jnp.float32),
        grid=(N,),
        in_specs=[x_spec, w_spec],
        out_specs=pl.BlockSpec((1, 2, Cpad), lambda n: (n, 0, 0)),
        scratch_shapes=scratch,
        compiler_params=cparams,
    )(x_nhwc, w_col)

    # Finalize global BatchNorm statistics (tiny per-channel math; biased variance).
    # BatchNorm sees (conv + bias): the constant bias shifts the mean, leaves the variance
    # unchanged, and cancels exactly in the normalization, so it is folded into `shift`.
    cnt = jnp.float32(N * H * W)
    tot = jnp.sum(stats, axis=0)                                   # (2, Cpad)
    mean_raw = tot[0] / cnt
    var = jnp.maximum(tot[1] / cnt - mean_raw * mean_raw, 0.0)
    mean = mean_raw + b_pad                                        # mean of conv + bias
    inv = jax.lax.rsqrt(var + eps)
    scale = g_pad * inv
    shift = (b_pad - mean) * scale + beta_pad                      # == beta - mean_raw*scale

    # Pass 2: conv recomputed + fused affine normalization, lane-dense (Cpad) output stores.
    out = pl.pallas_call(
        functools.partial(_conv_norm_kernel, **kern_kwargs),
        out_shape=jax.ShapeDtypeStruct((N, H, W, Cpad), jnp.float32),
        grid=(N,),
        in_specs=[x_spec, w_spec, vec_spec, vec_spec],
        out_specs=pl.BlockSpec((1, H, W, Cpad), lambda n: (n, 0, 0, 0)),
        scratch_shapes=scratch,
        compiler_params=cparams,
    )(x_nhwc, w_col, scale.reshape(1, Cpad), shift.reshape(1, Cpad))

    return jnp.transpose(out[..., :Cout], (0, 3, 1, 2))   # back to NCHW


def _reference(x_nchw, w_oihw, bias, gamma, beta, rate, eps=1e-5):
    """Pure-JAX reference for the module's forward.

    Conv operands are rounded to bf16 to match the kernel's MXU input precision (both sides
    accumulate in f32); all BatchNorm math is f32 in both.
    """
    x = jnp.transpose(x_nchw, (0, 2, 3, 1)).astype(jnp.bfloat16).astype(jnp.float32)
    w = jnp.transpose(w_oihw, (2, 3, 1, 0)).astype(jnp.bfloat16).astype(jnp.float32)
    y = jax.lax.conv_general_dilated(
        x, w,
        window_strides=(1, 1),
        padding=[(rate, rate), (rate, rate)],
        rhs_dilation=(rate, rate),
        dimension_numbers=("NHWC", "HWIO", "NHWC"),
    ) + bias
    mean = jnp.mean(y, axis=(0, 1, 2), keepdims=True)
    var = jnp.mean((y - mean) ** 2, axis=(0, 1, 2), keepdims=True)
    y = (y - mean) * jax.lax.rsqrt(var + eps) * gamma + beta
    return jnp.transpose(y, (0, 3, 1, 2))


if __name__ == "__main__":
    # Small shapes consistent with the module: inplanes=4, planes=8, rate=2, input (2, 4, 16, 16).
    N, Cin, Cout, H, W, rate = 2, 4, 8, 16, 16, 2

    key = jax.random.PRNGKey(0)
    kx, kwt, kb, kg, kbt = jax.random.split(key, 5)
    x = jax.random.normal(kx, (N, Cin, H, W), jnp.float32)
    w = jax.random.normal(kwt, (Cout, Cin, 3, 3), jnp.float32) * 0.1   # Conv2d weight (O, I, 3, 3)
    b = jax.random.normal(kb, (Cout,), jnp.float32) * 0.1              # Conv2d bias
    gamma = 1.0 + 0.1 * jax.random.normal(kg, (Cout,), jnp.float32)    # BN weight
    beta = 0.1 * jax.random.normal(kbt, (Cout,), jnp.float32)          # BN bias

    out = jax.block_until_ready(atrous_module_forward(x, w, b, gamma, beta, rate))
    ref = jax.block_until_ready(_reference(x, w, b, gamma, beta, rate))

    assert out.shape == (N, Cout, H, W), out.shape
    max_err = float(jnp.max(jnp.abs(out - ref)))
    assert jnp.allclose(out, ref, atol=2e-3, rtol=2e-3), max_err

    print("KERNEL_OK")
</pallas_src>

<mosaic_0001>
module attributes {stable_mosaic.version = 11 : i64} {
  func.func @_conv_stats_kernel(%arg0: i32, %arg1: memref<1x16x16x4xbf16, #tpu.memory_space<vmem>>, %arg2: memref<40x128xbf16, #tpu.memory_space<vmem>>, %arg3: memref<1x2x128xf32, #tpu.memory_space<vmem>>, %arg4: memref<1x16x16x40xbf16, #tpu.memory_space<vmem>>) attributes {dimension_semantics = [#tpu.dimension_semantics<parallel>], iteration_bounds = array<i64: 2>, scalar_prefetch = 0 : i64, scratch_operands = 1 : i64, tpu.core_type = #tpu.core_type<tc>, window_params = [{transform_indices = @transform_0, window_bounds = array<i64: 1, 16, 16, 4>}, {pipeline_mode = #tpu.pipeline_mode<synchronous>, transform_indices = @transform_1, window_bounds = array<i64: 40, 128>}, {transform_indices = @transform_2, window_bounds = array<i64: 1, 2, 128>}]} {
    %cst = arith.constant 0.000000e+00 : bf16
    %0 = vector.broadcast %cst : bf16 to vector<1x16x16x40xbf16>
    %c0 = arith.constant 0 : index
    %c0_0 = arith.constant 0 : index
    %c0_1 = arith.constant 0 : index
    %c0_2 = arith.constant 0 : index
    %1 = vector.load %arg4[%c0, %c0_0, %c0_1, %c0_2] : memref<1x16x16x40xbf16, #tpu.memory_space<vmem>>, vector<1x16x16x40xbf16>
    tpu.vector_store %arg4[%c0, %c0_0, %c0_1, %c0_2], %0 {strides = array<i32>} : memref<1x16x16x40xbf16, #tpu.memory_space<vmem>>, vector<1x16x16x40xbf16>,
    %c0_3 = arith.constant 0 : index
    %c0_4 = arith.constant 0 : index
    %c0_5 = arith.constant 0 : index
    %c0_6 = arith.constant 0 : index
    %2 = vector.load %arg1[%c0_3, %c0_4, %c0_5, %c0_6] : memref<1x16x16x4xbf16, #tpu.memory_space<vmem>>, vector<1x14x14x4xbf16>
    %c0_7 = arith.constant 0 : index
    %c2 = arith.constant 2 : index
    %c2_8 = arith.constant 2 : index
    %c0_9 = arith.constant 0 : index
    %3 = vector.load %arg4[%c0_7, %c2, %c2_8, %c0_9] : memref<1x16x16x40xbf16, #tpu.memory_space<vmem>>, vector<1x14x14x4xbf16>
    tpu.vector_store %arg4[%c0_7, %c2, %c2_8, %c0_9], %2 {strides = array<i32>} : memref<1x16x16x40xbf16, #tpu.memory_space<vmem>>, vector<1x14x14x4xbf16>,
    %c0_10 = arith.constant 0 : index
    %c0_11 = arith.constant 0 : index
    %c0_12 = arith.constant 0 : index
    %c0_13 = arith.constant 0 : index
    %4 = vector.load %arg1[%c0_10, %c0_11, %c0_12, %c0_13] : memref<1x16x16x4xbf16, #tpu.memory_space<vmem>>, vector<1x14x16x4xbf16>
    %c0_14 = arith.constant 0 : index
    %c2_15 = arith.constant 2 : index
    %c0_16 = arith.constant 0 : index
    %c4 = arith.constant 4 : index
    %5 = vector.load %arg4[%c0_14, %c2_15, %c0_16, %c4] : memref<1x16x16x40xbf16, #tpu.memory_space<vmem>>, vector<1x14x16x4xbf16>
    tpu.vector_store %arg4[%c0_14, %c2_15, %c0_16, %c4], %4 {strides = array<i32>} : memref<1x16x16x40xbf16, #tpu.memory_space<vmem>>, vector<1x14x16x4xbf16>,
    %c0_17 = arith.constant 0 : index
    %c0_18 = arith.constant 0 : index
    %c2_19 = arith.constant 2 : index
    %c0_20 = arith.constant 0 : index
    %6 = vector.load %arg1[%c0_17, %c0_18, %c2_19, %c0_20] : memref<1x16x16x4xbf16, #tpu.memory_space<vmem>>, vector<1x14x14x4xbf16>
    %c0_21 = arith.constant 0 : index
    %c2_22 = arith.constant 2 : index
    %c0_23 = arith.constant 0 : index
    %c8 = arith.constant 8 : index
    %7 = vector.load %arg4[%c0_21, %c2_22, %c0_23, %c8] : memref<1x16x16x40xbf16, #tpu.memory_space<vmem>>, vector<1x14x14x4xbf16>
    tpu.vector_store %arg4[%c0_21, %c2_22, %c0_23, %c8], %6 {strides = array<i32>} : memref<1x16x16x40xbf16, #tpu.memory_space<vmem>>, vector<1x14x14x4xbf16>,
    %c0_24 = arith.constant 0 : index
    %c0_25 = arith.constant 0 : index
    %c0_26 = arith.constant 0 : index
    %c0_27 = arith.constant 0 : index
    %8 = vector.load %arg1[%c0_24, %c0_25, %c0_26, %c0_27] : memref<1x16x16x4xbf16, #tpu.memory_space<vmem>>, vector<1x16x14x4xbf16>
    %c0_28 = arith.constant 0 : index
    %c0_29 = arith.constant 0 : index
    %c2_30 = arith.constant 2 : index
    %c12 = arith.constant 12 : index
    %9 = vector.load %arg4[%c0_28, %c0_29, %c2_30, %c12] : memref<1x16x16x40xbf16, #tpu.memory_space<vmem>>, vector<1x16x14x4xbf16>
    tpu.vector_store %arg4[%c0_28, %c0_29, %c2_30, %c12], %8 {strides = array<i32>} : memref<1x16x16x40xbf16, #tpu.memory_space<vmem>>, vector<1x16x14x4xbf16>,
    %c0_31 = arith.constant 0 : index
    %c0_32 = arith.constant 0 : index
    %c0_33 = arith.constant 0 : index
    %c0_34 = arith.constant 0 : index
    %10 = vector.load %arg1[%c0_31, %c0_32, %c0_33, %c0_34] : memref<1x16x16x4xbf16, #tpu.memory_space<vmem>>, vector<1x16x16x4xbf16>
    %c0_35 = arith.constant 0 : index
    %c0_36 = arith.constant 0 : index
    %c0_37 = arith.constant 0 : index
    %c16 = arith.constant 16 : index
    %11 = vector.load %arg4[%c0_35, %c0_36, %c0_37, %c16] : memref<1x16x16x40xbf16, #tpu.memory_space<vmem>>, vector<1x16x16x4xbf16>
    tpu.vector_store %arg4[%c0_35, %c0_36, %c0_37, %c16], %10 {strides = array<i32>} : memref<1x16x16x40xbf16, #tpu.memory_space<vmem>>, vector<1x16x16x4xbf16>,
    %c0_38 = arith.constant 0 : index
    %c0_39 = arith.constant 0 : index
    %c2_40 = arith.constant 2 : index
    %c0_41 = arith.constant 0 : index
    %12 = vector.load %arg1[%c0_38, %c0_39, %c2_40, %c0_41] : memref<1x16x16x4xbf16, #tpu.memory_space<vmem>>, vector<1x16x14x4xbf16>
    %c0_42 = arith.constant 0 : index
    %c0_43 = arith.constant 0 : index
    %c0_44 = arith.constant 0 : index
    %c20 = arith.constant 20 : index
    %13 = vector.load %arg4[%c0_42, %c0_43, %c0_44, %c20] : memref<1x16x16x40xbf16, #tpu.memory_space<vmem>>, vector<1x16x14x4xbf16>
    tpu.vector_store %arg4[%c0_42, %c0_43, %c0_44, %c20], %12 {strides = array<i32>} : memref<1x16x16x40xbf16, #tpu.memory_space<vmem>>, vector<1x16x14x4xbf16>,
    %c0_45 = arith.constant 0 : index
    %c2_46 = arith.constant 2 : index
    %c0_47 = arith.constant 0 : index
    %c0_48 = arith.constant 0 : index
    %14 = vector.load %arg1[%c0_45, %c2_46, %c0_47, %c0_48] : memref<1x16x16x4xbf16, #tpu.memory_space<vmem>>, vector<1x14x14x4xbf16>
    %c0_49 = arith.constant 0 : index
    %c0_50 = arith.constant 0 : index
    %c2_51 = arith.constant 2 : index
    %c24 = arith.constant 24 : index
    %15 = vector.load %arg4[%c0_49, %c0_50, %c2_51, %c24] : memref<1x16x16x40xbf16, #tpu.memory_space<vmem>>, vector<1x14x14x4xbf16>
    tpu.vector_store %arg4[%c0_49, %c0_50, %c2_51, %c24], %14 {strides = array<i32>} : memref<1x16x16x40xbf16, #tpu.memory_space<vmem>>, vector<1x14x14x4xbf16>,
    %c0_52 = arith.constant 0 : index
    %c2_53 = arith.constant 2 : index
    %c0_54 = arith.constant 0 : index
    %c0_55 = arith.constant 0 : index
    %16 = vector.load %arg1[%c0_52, %c2_53, %c0_54, %c0_55] : memref<1x16x16x4xbf16, #tpu.memory_space<vmem>>, vector<1x14x16x4xbf16>
    %c0_56 = arith.constant 0 : index
    %c0_57 = arith.constant 0 : index
    %c0_58 = arith.constant 0 : index
    %c28 = arith.constant 28 : index
    %17 = vector.load %arg4[%c0_56, %c0_57, %c0_58, %c28] : memref<1x16x16x40xbf16, #tpu.memory_space<vmem>>, vector<1x14x16x4xbf16>
    tpu.vector_store %arg4[%c0_56, %c0_57, %c0_58, %c28], %16 {strides = array<i32>} : memref<1x16x16x40xbf16, #tpu.memory_space<vmem>>, vector<1x14x16x4xbf16>,
    %c0_59 = arith.constant 0 : index
    %c2_60 = arith.constant 2 : index
    %c2_61 = arith.constant 2 : index
    %c0_62 = arith.constant 0 : index
    %18 = vector.load %arg1[%c0_59, %c2_60, %c2_61, %c0_62] : memref<1x16x16x4xbf16, #tpu.memory_space<vmem>>, vector<1x14x14x4xbf16>
    %c0_63 = arith.constant 0 : index
    %c0_64 = arith.constant 0 : index
    %c0_65 = arith.constant 0 : index
    %c32 = arith.constant 32 : index
    %19 = vector.load %arg4[%c0_63, %c0_64, %c0_65, %c32] : memref<1x16x16x40xbf16, #tpu.memory_space<vmem>>, vector<1x14x14x4xbf16>
    tpu.vector_store %arg4[%c0_63, %c0_64, %c0_65, %c32], %18 {strides = array<i32>} : memref<1x16x16x40xbf16, #tpu.memory_space<vmem>>, vector<1x14x14x4xbf16>,
    %c0_66 = arith.constant 0 : index
    %c0_67 = arith.constant 0 : index
    %c0_68 = arith.constant 0 : index
    %c0_69 = arith.constant 0 : index
    %20 = vector.load %arg4[%c0_66, %c0_67, %c0_68, %c0_69] : memref<1x16x16x40xbf16, #tpu.memory_space<vmem>>, vector<1x16x16x40xbf16>
    %21 = vector.shape_cast %20 : vector<1x16x16x40xbf16> to vector<256x40xbf16>
    %c0_70 = arith.constant 0 : index
    %c0_71 = arith.constant 0 : index
    %22 = vector.load %arg2[%c0_70, %c0_71] : memref<40x128xbf16, #tpu.memory_space<vmem>>, vector<40x128xbf16>
    %cst_72 = arith.constant dense<0.000000e+00> : vector<256x128xf32>
    %23 = tpu.matmul %21, %22, %cst_72 {dimension_numbers = #tpu.dot_dimension_numbers<[1], [0], [0], [1], [0, 0, 1, 1], [], []>} : vector<256x40xbf16>, vector<40x128xbf16>, vector<256x128xf32> -> vector<256x128xf32>
    %cst_73 = arith.constant dense<0.000000e+00> : vector<128xf32>
    %24 = vector.multi_reduction <add>, %23, %cst_73 [0] : vector<256x128xf32> to vector<128xf32>
    %25 = vector.shape_cast %24 : vector<128xf32> to vector<1x128xf32>
    %26 = arith.mulf %23, %23 : vector<256x128xf32>
    %cst_74 = arith.constant dense<0.000000e+00> : vector<128xf32>
    %27 = vector.multi_reduction <add>, %26, %cst_74 [0] : vector<256x128xf32> to vector<128xf32>
    %28 = vector.shape_cast %27 : vector<128xf32> to vector<1x128xf32>
    %29 = tpu.concatenate %25, %28 in 0 : vector<1x128xf32>, vector<1x128xf32> -> vector<2x128xf32>
    %30 = vector.shape_cast %29 : vector<2x128xf32> to vector<1x2x128xf32>
    %c0_75 = arith.constant 0 : index
    %c0_76 = arith.constant 0 : index
    %c0_77 = arith.constant 0 : index
    %31 = vector.load %arg3[%c0_75, %c0_76, %c0_77] : memref<1x2x128xf32, #tpu.memory_space<vmem>>, vector<1x2x128xf32>
    tpu.vector_store %arg3[%c0_75, %c0_76, %c0_77], %30 {strides = array<i32>} : memref<1x2x128xf32, #tpu.memory_space<vmem>>, vector<1x2x128xf32>,
    return
  }
  func.func @transform_0(%arg0: i32) -> (i32, i32, i32, i32) {
    %c0_i32 = arith.constant 0 : i32
    %c0_i32_0 = arith.constant 0 : i32
    %c0_i32_1 = arith.constant 0 : i32
    %c0_i32_2 = arith.constant 0 : i32
    return %arg0, %c0_i32, %c0_i32_0, %c0_i32_1 : i32, i32, i32, i32
  }
  func.func @transform_1(%arg0: i32) -> (i32, i32) {
    %c0_i32 = arith.constant 0 : i32
    %c0_i32_0 = arith.constant 0 : i32
    %c0_i32_1 = arith.constant 0 : i32
    return %c0_i32, %c0_i32_0 : i32, i32
  }
  func.func @transform_2(%arg0: i32) -> (i32, i32, i32) {
    %c0_i32 = arith.constant 0 : i32
    %c0_i32_0 = arith.constant 0 : i32
    %c0_i32_1 = arith.constant 0 : i32
    return %arg0, %c0_i32, %c0_i32_0 : i32, i32, i32
  }
}

</mosaic_0001>

<bundles_post_ra>
// kernel: tpu_custom_call.1
= control target key start
LH: loop header
LB: loop body
LE: loop exit
PB: predicated region body
PF: predicated region fallthrough
CT: control target
= control target key end

     0   :  { %7 = vsyncpa [#allocation4], 0  ;;  %s3225_s0 = inlined_call_operand.vmem [shape: bf16[2,16,16,4], index: 0, kind: input, shape index: {}]   ;;  %s3226_s1 = inlined_call_operand.vmem [shape: bf16[40,128], index: 1, kind: input, shape index: {}]   ;;  %s3227_s2 = inlined_call_operand.hbm [shape: f32[2,2,128], index: 2, kind: output, shape index: {}]  }
   0x1   :  { %9 = vsyncpa [#allocation4 + $0x1], 0  ;;  %s2698_s9 = smov 0   ;;  %s2700_s10 = smov 0  }
   0x2   :  { %s2702_s11 = smov 0   ;;  %s2704_s12 = smov 0  }
   0x3 LB: > { %s2719_s13 = sadd.s32 4294967295, %s2671_s12   ;;  %s2114_s14 = sadd.s32 4294967294, %s2671_s12   ;;  %s2671_s12 = sphi %s2704_s12, %s3233_s12   ;;  %s2667_s11 = sphi %s2702_s11, %s3232_s11   ;;  %s2663_s10 = sphi %s2700_s10, %s3231_s10   ;;  %s2659_s9 = sphi %s2698_s9, %s3230_s9  }
   0x4   : > { %s2723_s15 = sadd.s32 1, %s2671_s12   ;;  %s69_s16 = sadd.s32 1, %s2667_s11 }
   0x5   : > { %s66_s17 = ssub.s32 %s2671_s12, %s2723_s15  ;;  %p79_p0 = scmp.ne.s32.totalorder %s2667_s11, %s2663_s10 }
   0x6   : > { %p67_p1 = scmp.eq.s32.totalorder %s66_s17, 0  ;;  %p80_p2 = scmp.eq.s32.totalorder %s2719_s13, 1 }
   0x7   : > { %p85_p3 = scmp.ne.s32.totalorder %s2663_s10, %s2659_s9  ;;  %p86_p4 = scmp.eq.s32.totalorder %s2114_s14, 1 }
   0x8   : > { %s2734_s18 = scalar_select %p67_p1, %s2667_s11, %s69_s16  }
   0x9   : > { %p2736_p5 = por %p80_p2, %p79_p0  ;;  %p2740_p6 = por %p86_p4, %p85_p3 }
   0xa   : > { %p2117_p7 = scmp.ge.s32.totalorder %s2671_s12, 1  ;;  %p115_p8 = scmp.lt.s32.totalorder %s2671_s12, 3 }
   0xc   : > { %p116_p9 = pnand %p2117_p7, %p115_p8 }
   0xd   : > { %p137_p10 = scmp.lt.s32.totalorder (!%p116_p9), %s2719_s13, 1  ;;  %vm143_vm0 = vcmask (!%p116_p9), 326656   ;;  %v2673_v0 = vmov (!%p116_p9), 0   ;;  %s2674_s26 = smov (!%p116_p9), 16   ;;  %v2544_v46 = vld [vmem:[%s3226_s1] sm:$0xff] (!%p116_p9)   ;;  %v2548_v49 = vld [vmem:[%s3226_s1 + $0x8] sm:$0xff] (!%p116_p9)  }
   0xe   : > { %119 = sbr.rel (%p116_p9) target bundleno = 635 (0x27b), region = 28  ;;  %144 = vst.msk [vmem:[#allocation2] sm:$0xff] (!%p116_p9), %vm143_vm0, %v2673_v0  ;;  %145 = vst.msk [vmem:[#allocation2 + $0x8] sm:$0xff] (!%p116_p9), %vm143_vm0, %v2673_v0  ;;  %s2675_s27 = smov (!%p116_p9), 12   ;;  %2380 = vmatprep.subr.bf16.mxu0 (!%p116_p9), %v2544_v46  ;;  %2418 = vmatprep.subr.bf16.mxu1 (!%p116_p9), %v2544_v46  ;;  %vm287_vm1 = vcmask (!%p116_p9), 31745   ;;  %vm1767_vm2 = vcmask (!%p116_p9), 1043456  }
   0xf   : > { %146 = vst.msk [vmem:[#allocation2 + $0x10] sm:$0xff] (!%p116_p9), %vm143_vm0, %v2673_v0  ;;  %147 = vst.msk [vmem:[#allocation2 + $0x18] sm:$0xff] (!%p116_p9), %vm143_vm0, %v2673_v0  ;;  %s2676_s28 = smov (!%p116_p9), 20   ;;  %s2677_s29 = smov (!%p116_p9), 24   ;;  %2381 = vmatpush3.bf16.msra.mxu0 (!%p116_p9), %v2544_v46  ;;  %2421 = vmatpush3.bf16.msra.mxu1 (!%p116_p9), %v2544_v46  ;;  %vm802_vm3 = vcmask (!%p116_p9), 130145   ;;  %vm979_vm4 = vcmask (!%p116_p9), 162944  }
  0x10   : > { %148 = vst.msk [vmem:[#allocation2 + $0x20] sm:$0xff] (!%p116_p9), %vm143_vm0, %v2673_v0  ;;  %149 = vst.msk [vmem:[#allocation2 + $0x28] sm:$0xff] (!%p116_p9), %vm143_vm0, %v2673_v0  ;;  %s2678_s30 = smov (!%p116_p9), 28   ;;  %s2679_s3 = smov (!%p116_p9), 4   ;;  %2382 = vmatprep.subr.bf16.mxu0 (!%p116_p9), %v2548_v49  ;;  %2419 = vmatprep.subr.bf16.mxu1 (!%p116_p9), %v2548_v49  ;;  %vm1172_vm5 = vcmask (!%p116_p9), 194720   ;;  %vm1344_vm6 = vcmask (!%p116_p9), 228545  }
  0x11   : > { %150 = vst.msk [vmem:[#allocation2 + $0x30] sm:$0xff] (!%p116_p9), %vm143_vm0, %v2673_v0  ;;  %151 = vst.msk [vmem:[#allocation2 + $0x38] sm:$0xff] (!%p116_p9), %vm143_vm0, %v2673_v0  ;;  %s2680_s4 = smov (!%p116_p9), 32   ;;  %s2681_s5 = smov (!%p116_p9), 8   ;;  %vm1499_vm7 = vcmask (!%p116_p9), 261344   ;;  %vm442_vm8 = vcmask (!%p116_p9), 64544  }
  0x12   : > { %152 = vst.msk [vmem:[#allocation2 + $0x40] sm:$0xff] (!%p116_p9), %vm143_vm0, %v2673_v0  ;;  %153 = vst.msk [vmem:[#allocation2 + $0x48] sm:$0xff] (!%p116_p9), %vm143_vm0, %v2673_v0  ;;  %vm1668_vm9 = vcmask (!%p116_p9), 293120   ;;  %vm611_vm10 = vcmask (!%p116_p9), 96320   ;;  %s2357_s23 = sshll.u32 (!%p116_p9), %s2719_s13, 5  ;;  %vm2038_vm11 = vcmask (!%p116_p9), 1040384  }
  0x13   : > { %154 = vst.msk [vmem:[#allocation2 + $0x50] sm:$0xff] (!%p116_p9), %vm143_vm0, %v2673_v0  ;;  %155 = vst.msk [vmem:[#allocation2 + $0x58] sm:$0xff] (!%p116_p9), %vm143_vm0, %v2673_v0  ;;  %2383 = vmatpush3.bf16.msra.mxu0 (!%p116_p9), %v2548_v49  ;;  %2422 = vmatpush3.bf16.msra.mxu1 (!%p116_p9), %v2548_v49 }
  0x14   : > { %156 = vst.msk [vmem:[#allocation2 + $0x60] sm:$0xff] (!%p116_p9), %vm143_vm0, %v2673_v0  ;;  %157 = vst.msk [vmem:[#allocation2 + $0x68] sm:$0xff] (!%p116_p9), %vm143_vm0, %v2673_v0 }
  0x15   : > { %158 = vst.msk [vmem:[#allocation2 + $0x70] sm:$0xff] %vm143_vm0, %v2673_v0  ;;  %159 = vst.msk [vmem:[#allocation2 + $0x78] sm:$0xff] %vm143_vm0, %v2673_v0  ;;  %s138_s21 = scalar_select %p137_p10, %s2719_s13, 1 }
  0x16   : > { %s2682_s13 = smov [#allocation3]  }
  0x17   : > { %s2360_s22 = sshll.u32 %s138_s21, 7  ;;  %s134_s21 = sand.u32 1, %s2663_s10  }
  0x18   : > { %s2769_s25 = scalar_lea.vmem %s3225_s0, %s2360_s22  ;;  %s2118_s22 = sshll.u32 %s134_s21, 1 }
  0x19   : > { %v2474_v1 = vld [vmem:[%s2769_s25] sm:$0xff]   ;;  %v2476_v3 = vld [vmem:[%s2769_s25 + $0x8] sm:$0xff]   ;;  %v2480_v10 = vld [vmem:[%s2769_s25 + $0x18] sm:$0x7f]   ;;  %s136_s24 = scalar_lea.vmem [#allocation3], %s2118_s22 }
  0x1a   : > { %v2475_v2 = vld [vmem:[%s2769_s25] sm:$0x7f]   ;;  %931 = vrot.lane.b32.xlu1 %v2474_v1, %s2674_s26  ;;  %v2477_v5 = vld [vmem:[%s2769_s25 + $0x8] sm:$0x7f]   ;;  %v1289_v12 = vrot.slane %v2480_v10, 7  ;;  %v2482_v15 = vld [vmem:[%s2769_s25 + $0x18] sm:$0xff]  }
  0x1b   : > { %v738_v4 = vrot.slane %v2475_v2, 7  ;;  %v2478_v6 = vld [vmem:[%s2769_s25 + $0x8] sm:$0xfe]   ;;  %v739_v7 = vrot.slane %v2477_v5, 7  ;;  %v2479_v8 = vld [vmem:[%s2769_s25] sm:$0xfe]  }
  0x1c   : > { %v1109_v9 = vrot.slane %v2478_v6, 1  ;;  %v1108_v11 = vrot.slane %v2479_v8, 1  ;;  %v2481_v13 = vld [vmem:[%s2769_s25 + $0x10] sm:$0x7f]   ;;  %v2484_v18 = vld [vmem:[%s2769_s25] sm:$0xff]   ;;  %v2486_v22 = vld [vmem:[%s2769_s25 + $0x8] sm:$0xff]  }
  0x1d   : > { %754 = vrot.lane.b32.xlu0 %v738_v4, %s2675_s27  ;;  %v1288_v14 = vrot.slane %v2481_v13, 7  ;;  %v2485_v16 = vld [vmem:[%s2769_s25 + $0x10] sm:$0xfe]   ;;  %v2487_v20 = vld [vmem:[%s2769_s25 + $0x18] sm:$0xfe]   ;;  %v2498_v41 = vld [vmem:[%s2769_s25 + $0x28] sm:$0xff]  }
  0x1e   : > { %933 = vrot.lane.b32.xlu1 %v2476_v3, %s2674_s26  ;;  %v2483_v17 = vld [vmem:[%s2769_s25 + $0x10] sm:$0xff]   ;;  %v1612_v19 = vrot.slane %v2485_v16, 1  ;;  %v2488_v21 = vld [vmem:[%s2769_s25 + $0x8] sm:$0xfe]   ;;  %v2489_v23 = vld [vmem:[%s2769_s25] sm:$0xfe]  }
  0x1f   : > { %v1613_v24 = vrot.slane %v2487_v20, 1  ;;  %v556_v25 = vrot.slane %v2488_v21, 1  ;;  %v2490_v26 = vld [vmem:[%s2769_s25 + $0x18] sm:$0x7f]   ;;  %v555_v27 = vrot.slane %v2489_v23, 1  ;;  %v2493_v34 = vld [vmem:[%s2769_s25 + $0x10] sm:$0xff]  }
  0x20   : > { %v2491_v28 = vld [vmem:[%s2769_s25 + $0x10] sm:$0x7f]   ;;  %v741_v29 = vrot.slane %v2490_v26, 7  ;;  %v2494_v31 = vld [vmem:[%s2769_s25 + $0x18] sm:$0xfe]   ;;  %v2499_v42 = vld [vmem:[%s2769_s25 + $0x20] sm:$0xff]  }
  0x21   : > { %756 = vrot.lane.b32.xlu0 %v739_v7, %s2675_s27  ;;  %v740_v30 = vrot.slane %v2491_v28, 7  ;;  %v2492_v32 = vld [vmem:[%s2769_s25 + $0x18] sm:$0xff]   ;;  %v2495_v33 = vld [vmem:[%s2769_s25 + $0x10] sm:$0xfe]   ;;  %v1111_v35 = vrot.slane %v2494_v31, 1  ;;  %v2508_v59 = vld [vmem:[%s2769_s25 + $0x28] sm:$0xff]  }
  0x22   : > { %1126 = vrot.lane.b32.xlu1 %v1109_v9, %s2676_s28  ;;  %v2496_v36 = vld [vmem:[%s2769_s25 + $0x28] sm:$0x7f]   ;;  %v1110_v37 = vrot.slane %v2495_v33, 1  ;;  %v2497_v38 = vld [vmem:[%s2769_s25 + $0x20] sm:$0x7f]   ;;  %v2500_v44 = vld [vmem:[%s2769_s25 + $0x10] sm:$0xff]  }
  0x23   : > { %v1291_v39 = vrot.slane %v2496_v36, 7  ;;  %v1290_v40 = vrot.slane %v2497_v38, 7  ;;  %v2501_v43 = vld [vmem:[%s2769_s25 + $0x20] sm:$0xfe]   ;;  %v2503_v45 = vld [vmem:[%s2769_s25 + $0x28] sm:$0xfe]  }
  0x24   : > { %v1614_v47 = vrot.slane %v2501_v43, 1  ;;  %v2502_v48 = vld [vmem:[%s2769_s25 + $0x18] sm:$0xff]   ;;  %v1615_v51 = vrot.slane %v2503_v45, 1  ;;  %v2505_v52 = vld [vmem:[%s2769_s25 + $0x10] sm:$0xfe]   ;;  %v2509_v61 = vld [vmem:[%s2769_s25 + $0x20] sm:$0xff]  }
  0x25   : > { %1124 = vrot.lane.b32.xlu0 %v1108_v11, %s2676_s28  ;;  %v2504_v50 = vld [vmem:[%s2769_s25 + $0x18] sm:$0xfe]   ;;  %v2506_v53 = vld [vmem:[%s2769_s25 + $0x28] sm:$0x7f]   ;;  %v2507_v55 = vld [vmem:[%s2769_s25 + $0x20] sm:$0x7f]  }
  0x26   : > { %1304 = vrot.lane.b32.xlu1 %v1289_v12, %s2677_s29  ;;  %v558_v54 = vrot.slane %v2504_v50, 1  ;;  %v557_v56 = vrot.slane %v2505_v52, 1  ;;  %v743_v57 = vrot.slane %v2506_v53, 7  ;;  %v742_v58 = vrot.slane %v2507_v55, 7  ;;  %v2510_v60 = vld [vmem:[%s2769_s25 + $0x28] sm:$0xfe]  }
  0x27   : > { %v2511_v62 = vld [vmem:[%s2769_s25 + $0x20] sm:$0xfe]   ;;  %v2512_v63 = vld [vmem:[%s2769_s25 + $0x38] sm:$0x7f]   ;;  %v1113_v0 = vrot.slane %v2510_v60, 1  ;;  %v2515_v11 = vld [vmem:[%s2769_s25 + $0x30] sm:$0xff]  }
  0x28   : > { %v2513_v1 = vld [vmem:[%s2769_s25 + $0x30] sm:$0x7f]   ;;  %v1112_v2 = vrot.slane %v2511_v62, 1  ;;  %v1293_v3 = vrot.slane %v2512_v63, 7  ;;  %v2542_v4 = vld [vmem:[%s2769_s25] sm:$0x7f]  }
  0x29   : > { %1302 = vrot.lane.b32.xlu0 %v1288_v14, %s2677_s29  ;;  %v258_v5 = vrot.slane %v2542_v4, 7  ;;  %v1292_v6 = vrot.slane %v2513_v1, 7  ;;  %v2514_v7 = vld [vmem:[%s2769_s25 + $0x38] sm:$0xff]   ;;  %v2546_v8 = vld [vmem:[%s2769_s25 + $0x8] sm:$0x7f]   ;;  %v2516_v12 = vld [vmem:[%s2769_s25 + $0x20] sm:$0xff]  }
  0x2a   : > { %1459 = vrot.lane.b32.xlu1 %v2482_v15, %s2678_s30  ;;  %v2517_v9 = vld [vmem:[%s2769_s25 + $0x30] sm:$0xfe]   ;;  %v259_v10 = vrot.slane %v2546_v8, 7  ;;  %v2551_v13 = vld [vmem:[%s3226_s1 + $0x10] ss:$0 sps:$4 sm:$0xff]   ;;  %v2518_v16 = vld [vmem:[%s2769_s25 + $0x28] sm:$0xff]  }
  0x2b   : > { %288 = vst.msk [vmem:[#allocation2 + $0x10] sm:$0xfe] %vm287_vm1, %v258_v5  ;;  %v2519_v14 = vld [vmem:[%s2769_s25 + $0x38] sm:$0xfe]   ;;  %v1616_v15 = vrot.slane %v2517_v9, 1  ;;  %2424 = vmatprep.subr.msk.bf16.mxu0 %vm1767_vm2, %v2551_v13  ;;  %2425 = vmatprep.subr.msk.bf16.mxu1 %vm1767_vm2, %v2551_v13  ;;  %v2540_v5 = vld [vmem:[%s2769_s25 + $0x48] sm:$0xff]  }
  0x2c   : > { %289 = vst.msk [vmem:[#allocation2 + $0x18] sm:$0xfe] %vm287_vm1, %v259_v10  ;;  %v1617_v20 = vrot.slane %v2519_v14, 1  ;;  %v2563_v26 = vld [vmem:[%s2769_s25 + $0x10] sm:$0x7f]  }
  0x2d   : > { %1457 = vrot.lane.b32.xlu0 %v2483_v17, %s2678_s30  ;;  %v1769_v17 = vsel %vm1767_vm2, %v2551_v13, 0  ;;  %v2527_v31 = vld [vmem:[%s2769_s25 + $0x30] sm:$0xfe]   ;;  %v2566_v33 = vld [vmem:[%s2769_s25 + $0x18] sm:$0x7f]  }
  0x2e   : > { %400 = vrot.lane.b32.xlu1 %v2484_v18, %s2679_s3  ;;  %v2520_v18 = vld [vmem:[%s2769_s25 + $0x28] sm:$0xfe]   ;;  %2385 = vmatpush3.bf16.msra.mxu0 %v1769_v17  ;;  %v2533_v43 = vld [vmem:[%s2769_s25 + $0x40] sm:$0xfe]   ;;  %v2536_v49 = vld [vmem:[%s2769_s25 + $0x38] sm:$0xfe]  }
  0x2f   : > { %2423 = vmatpush3.bf16.msra.mxu1 %v1769_v17  ;;  %v560_v21 = vrot.slane %v2520_v18, 1  ;;  %v2581_v45 = vld [vmem:[%s2769_s25 + $0x20] sm:$0x7f]   ;;  %v2584_v53 = vld [vmem:[%s2769_s25 + $0x28] sm:$0x7f]  }
  0x30   : > { %v262_v50 = vrot.slane %v2581_v45, 7  ;;  %v2537_v55 = vld [vmem:[%s2769_s25 + $0x30] sm:$0xfe]   ;;  %v2539_v63 = vld [vmem:[%s2769_s25 + $0x40] sm:$0x7f]  }
  0x31   : > { %1626 = vrot.lane.b32.xlu0 %v1612_v19, %s2680_s4  ;;  %v2521_v19 = vld [vmem:[%s2769_s25 + $0x20] sm:$0xfe]   ;;  %v561_v62 = vrot.slane %v2537_v55, 1  ;;  %v746_v4 = vrot.slane %v2539_v63, 7  ;;  %v2599_v13 = vld [vmem:[%s2769_s25 + $0x30] sm:$0x7f]  }
  0x32   : > { %402 = vrot.lane.b32.xlu1 %v2486_v22, %s2679_s3  ;;  %v2522_v22 = vld [vmem:[%s2769_s25 + $0x38] sm:$0x7f]   ;;  %v559_v23 = vrot.slane %v2521_v19, 1  ;;  %292 = vst.msk [vmem:[#allocation2 + $0x30] sm:$0xfe] %vm287_vm1, %v262_v50  ;;  %v264_v17 = vrot.slane %v2599_v13, 7 }
  0x33   : > { %v2545_v10 = vld [vmem:[%s2769_s25 + $0x40] sm:$0xfe]   ;;  %v2567_v63 = vld [vmem:[%s2769_s25 + $0x68] sm:$0x7f]  }
  0x34   : > { %294 = vst.msk [vmem:[#allocation2 + $0x40] sm:$0xfe] %vm287_vm1, %v264_v17  ;;  %v2558_v45 = vld [vmem:[%s2769_s25 + $0x40] sm:$0xfe]   ;;  %v2571_v17 = vld [vmem:[%s2769_s25 + $0x50] sm:$0xff]  }
  0x35   : > { %1628 = vrot.lane.b32.xlu0 %v1613_v24, %s2680_s4  ;;  %v2523_v24 = vld [vmem:[%s2769_s25 + $0x30] sm:$0x7f]   ;;  %v563_v50 = vrot.slane %v2558_v45, 1  ;;  %v2583_v45 = vld [vmem:[%s2769_s25 + $0x60] sm:$0xfe]  }
  0x36   : > { %571 = vrot.lane.b32.xlu1 %v556_v25, %s2681_s5  ;;  %v745_v25 = vrot.slane %v2522_v22, 7  ;;  %v744_v28 = vrot.slane %v2523_v24, 7  ;;  %v2603_v22 = vld [vmem:[%s2769_s25 + $0x40] sm:$0x7f]  }
  0x39   : > { %569 = vrot.lane.b32.xlu0 %v555_v27, %s2681_s5  ;;  %v2524_v27 = vld [vmem:[%s2769_s25 + $0x38] sm:$0xff]  }
  0x3a   : > { %760 = vrot.lane.b32.xlu1 %v741_v29, %s2675_s27  ;;  %v2526_v29 = vld [vmem:[%s2769_s25 + $0x38] sm:$0xfe]  }
  0x3b   : > { %v1115_v36 = vrot.slane %v2526_v29, 1 }
  0x3d   : > { %758 = vrot.lane.b32.xlu0 %v740_v30, %s2675_s27  ;;  %v260_v30 = vrot.slane %v2563_v26, 7  ;;  %v2550_v26 = vld [vmem:[%s2769_s25 + $0x58] sm:$0xff]  }
  0x3e   : > { %937 = vrot.lane.b32.xlu1 %v2492_v32, %s2674_s26  ;;  %v2528_v32 = vld [vmem:[%s2769_s25 + $0x48] sm:$0x7f]  }
  0x3f   : > { %290 = vst.msk [vmem:[#allocation2 + $0x20] sm:$0xfe] %vm287_vm1, %v260_v30  ;;  %v1295_v38 = vrot.slane %v2528_v32, 7  ;;  %v2554_v32 = vld [vmem:[%s2769_s25 + $0x50] sm:$0xfe]  }
  0x41   : > { %935 = vrot.lane.b32.xlu0 %v2493_v34, %s2674_s26  ;;  %v2525_v34 = vld [vmem:[%s2769_s25 + $0x30] sm:$0xff]  }
  0x42   : > { %1130 = vrot.lane.b32.xlu1 %v1111_v35, %s2676_s28  ;;  %v261_v35 = vrot.slane %v2566_v33, 7  ;;  %v2553_v33 = vld [vmem:[%s2769_s25 + $0x40] sm:$0xff]  }
  0x44   : > { %291 = vst.msk [vmem:[#allocation2 + $0x28] sm:$0xfe] %vm287_vm1, %v261_v35 }
  0x45   : > { %1128 = vrot.lane.b32.xlu0 %v1110_v37, %s2676_s28  ;;  %v1114_v37 = vrot.slane %v2527_v31, 1  ;;  %v2552_v31 = vld [vmem:[%s2769_s25 + $0x50] sm:$0xff]  }
  0x46   : > { %1308 = vrot.lane.b32.xlu1 %v1291_v39, %s2677_s29  ;;  %v2529_v39 = vld [vmem:[%s2769_s25 + $0x40] sm:$0x7f]  }
  0x49   : > { %1306 = vrot.lane.b32.xlu0 %v1290_v40, %s2677_s29  ;;  %v1294_v40 = vrot.slane %v2529_v39, 7  ;;  %v2555_v39 = vld [vmem:[%s2769_s25 + $0x48] sm:$0xff]  }
  0x4a   : > { %1463 = vrot.lane.b32.xlu1 %v2498_v41, %s2678_s30  ;;  %v2530_v41 = vld [vmem:[%s2769_s25 + $0x48] sm:$0xff]  }
  0x4d   : > { %1461 = vrot.lane.b32.xlu0 %v2499_v42, %s2678_s30  ;;  %v2531_v42 = vld [vmem:[%s2769_s25 + $0x40] sm:$0xff]  }
  0x4e   : > { %404 = vrot.lane.b32.xlu1 %v2500_v44, %s2679_s3  ;;  %v2532_v44 = vld [vmem:[%s2769_s25 + $0x30] sm:$0xff]  }
  0x51   : > { %1630 = vrot.lane.b32.xlu0 %v1614_v47, %s2680_s4  ;;  %v2535_v47 = vld [vmem:[%s2769_s25 + $0x48] sm:$0xfe]  }
  0x52   : > { %406 = vrot.lane.b32.xlu1 %v2502_v48, %s2679_s3  ;;  %v1618_v48 = vrot.slane %v2533_v43, 1 }
  0x55   : > { %1632 = vrot.lane.b32.xlu0 %v1615_v51, %s2680_s4  ;;  %v2534_v51 = vld [vmem:[%s2769_s25 + $0x38] sm:$0xff]  }
  0x56   : > { %575 = vrot.lane.b32.xlu1 %v558_v54, %s2681_s5 }
  0x59   : > { %573 = vrot.lane.b32.xlu0 %v557_v56, %s2681_s5  ;;  %v1619_v56 = vrot.slane %v2535_v47, 1  ;;  %v2559_v47 = vld [vmem:[%s2769_s25 + $0x58] sm:$0x7f]  }
  0x5a   : > { %764 = vrot.lane.b32.xlu1 %v743_v57, %s2675_s27  ;;  %v562_v57 = vrot.slane %v2536_v49, 1 }
  0x5d   : > { %762 = vrot.lane.b32.xlu0 %v742_v58, %s2675_s27  ;;  %v263_v58 = vrot.slane %v2584_v53, 7 }
  0x5e   : > { %941 = vrot.lane.b32.xlu1 %v2508_v59, %s2674_s26  ;;  %v2538_v59 = vld [vmem:[%s2769_s25 + $0x48] sm:$0x7f]  }
  0x5f   : > { %293 = vst.msk [vmem:[#allocation2 + $0x38] sm:$0xfe] %vm287_vm1, %v263_v58 }
  0x61   : > { %939 = vrot.lane.b32.xlu0 %v2509_v61, %s2674_s26 }
  0x62   : > { %1134 = vrot.lane.b32.xlu1 %v1113_v0, %s2676_s28  ;;  %v747_v0 = vrot.slane %v2538_v59, 7 }
  0x65   : > { %1132 = vrot.lane.b32.xlu0 %v1112_v2, %s2676_s28 }
  0x66   : > { %1312 = vrot.lane.b32.xlu1 %v1293_v3, %s2677_s29  ;;  %v2543_v3 = vld [vmem:[%s2769_s25 + $0x48] sm:$0xfe]  }
  0x67   : > { %v1117_v9 = vrot.slane %v2543_v3, 1 }
  0x69   : > { %1310 = vrot.lane.b32.xlu0 %v1292_v6, %s2677_s29 }
  0x6a   : > { %1467 = vrot.lane.b32.xlu1 %v2514_v7, %s2678_s30  ;;  %v2541_v7 = vld [vmem:[%s2769_s25 + $0x40] sm:$0xff]  }
  0x6d   : > { %1465 = vrot.lane.b32.xlu0 %v2515_v11, %s2678_s30  ;;  %v2547_v11 = vld [vmem:[%s2769_s25 + $0x58] sm:$0x7f]  }
  0x6e   : > { %408 = vrot.lane.b32.xlu1 %v2516_v12, %s2679_s3  ;;  %v1297_v18 = vrot.slane %v2547_v11, 7  ;;  %v2569_v11 = vld [vmem:[%s2769_s25 + $0x68] sm:$0xff]  }
  0x71   : > { %1634 = vrot.lane.b32.xlu0 %v1616_v15, %s2680_s4  ;;  %v1116_v15 = vrot.slane %v2545_v10, 1 }
  0x72   : > { %410 = vrot.lane.b32.xlu1 %v2518_v16, %s2679_s3  ;;  %v2549_v16 = vld [vmem:[%s2769_s25 + $0x50] sm:$0x7f]  }
  0x75   : > { %1636 = vrot.lane.b32.xlu0 %v1617_v20, %s2680_s4  ;;  %v2602_v20 = vld [vmem:[%s2769_s25 + $0x38] sm:$0x7f]  }
  0x76   : > { %579 = vrot.lane.b32.xlu1 %v560_v21, %s2681_s5  ;;  %v265_v24 = vrot.slane %v2602_v20, 7 }
  0x78   : > { %295 = vst.msk [vmem:[#allocation2 + $0x48] sm:$0xfe] %vm287_vm1, %v265_v24  ;;  %v2575_v24 = vld [vmem:[%s2769_s25 + $0x58] sm:$0xfe]  }
  0x79   : > { %577 = vrot.lane.b32.xlu0 %v559_v23, %s2681_s5  ;;  %v1296_v23 = vrot.slane %v2549_v16, 7  ;;  %v2572_v16 = vld [vmem:[%s2769_s25 + $0x60] sm:$0xfe]  }
  0x7a   : > { %768 = vrot.lane.b32.xlu1 %v745_v25, %s2675_s27  ;;  %v2604_v25 = vld [vmem:[%s2769_s25 + $0x48] sm:$0x7f]  }
  0x7b   : > { %v267_v29 = vrot.slane %v2604_v25, 7 }
  0x7d   : > { %766 = vrot.lane.b32.xlu0 %v744_v28, %s2675_s27  ;;  %297 = vst.msk [vmem:[#allocation2 + $0x58] sm:$0xfe] %vm287_vm1, %v267_v29  ;;  %v2576_v29 = vld [vmem:[%s2769_s25 + $0x50] sm:$0xfe]  }
  0x7e   : > { %945 = vrot.lane.b32.xlu1 %v2524_v27, %s2674_s26  ;;  %v266_v27 = vrot.slane %v2603_v22, 7  ;;  %v2574_v22 = vld [vmem:[%s2769_s25 + $0x68] sm:$0xfe]  }
  0x80   : > { %296 = vst.msk [vmem:[#allocation2 + $0x50] sm:$0xfe] %vm287_vm1, %v266_v27 }
  0x81   : > { %943 = vrot.lane.b32.xlu0 %v2525_v34, %s2674_s26 }
  0x82   : > { %1138 = vrot.lane.b32.xlu1 %v1115_v36, %s2676_s28 }
  0x85   : > { %1136 = vrot.lane.b32.xlu0 %v1114_v37, %s2676_s28  ;;  %v1620_v37 = vrot.slane %v2554_v32, 1 }
  0x86   : > { %1316 = vrot.lane.b32.xlu1 %v1295_v38, %s2677_s29  ;;  %v2556_v38 = vld [vmem:[%s2769_s25 + $0x58] sm:$0xfe]  }
  0x89   : > { %1314 = vrot.lane.b32.xlu0 %v1294_v40, %s2677_s29  ;;  %v2557_v40 = vld [vmem:[%s2769_s25 + $0x48] sm:$0xfe]  }
  0x8a   : > { %1471 = vrot.lane.b32.xlu1 %v2530_v41, %s2678_s30 }
  0x8c   : > { %v932_v46 = vpop.permute.xlu1 %931 }
  0x8d   : > { %1469 = vrot.lane.b32.xlu0 %v2531_v42, %s2678_s30 }
  0x8e   : > { %412 = vrot.lane.b32.xlu1 %v2532_v44, %s2679_s3  ;;  %v1621_v44 = vrot.slane %v2556_v38, 1 }
  0x8f   : > { %v755_v52 = vpop.permute.xlu0 %754 }
  0x90   : > { %803 = vst.msk [vmem:[#allocation2] sm:$0xfe] %vm802_vm3, %v755_v52  ;;  %v934_v54 = vpop.permute.xlu1 %933  ;;  %v749_v52 = vrot.slane %v2559_v47, 7  ;;  %v2585_v47 = vld [vmem:[%s2769_s25 + $0x78] sm:$0x7f]  }
  0x91   : > { %1638 = vrot.lane.b32.xlu0 %v1618_v48, %s2680_s4  ;;  %980 = vst.msk [vmem:[#allocation2] sm:$0xff] %vm979_vm4, %v932_v46  ;;  %v564_v46 = vrot.slane %v2557_v40, 1  ;;  %v2579_v40 = vld [vmem:[%s2769_s25 + $0x68] sm:$0xff]  }
  0x92   : > { %414 = vrot.lane.b32.xlu1 %v2534_v51, %s2679_s3  ;;  %v2560_v51 = vld [vmem:[%s2769_s25 + $0x50] sm:$0x7f]  }
  0x93   : > { %v757_v60 = vpop.permute.xlu0 %756  ;;  %v748_v55 = vrot.slane %v2560_v51, 7  ;;  %v2586_v51 = vld [vmem:[%s2769_s25 + $0x70] sm:$0x7f]  }
  0x94   : > { %804 = vst.msk [vmem:[#allocation2 + $0x8] sm:$0xfe] %vm802_vm3, %v757_v60  ;;  %v1127_v61 = vpop.permute.xlu1 %1126  ;;  %v2562_v60 = vld [vmem:[%s2769_s25 + $0x50] sm:$0xff]  }
  0x95   : > { %981 = vst.msk [vmem:[#allocation2 + $0x8] sm:$0xff] %vm979_vm4, %v934_v54  ;;  %1640 = vrot.lane.b32.xlu0 %v1619_v56, %s2680_s4  ;;  %v2561_v56 = vld [vmem:[%s2769_s25 + $0x58] sm:$0xff]  }
  0x96   : > { %1174 = vst.msk [vmem:[#allocation2 + $0x8] sm:$0x7f] %vm1172_vm5, %v1127_v61  ;;  %583 = vrot.lane.b32.xlu1 %v562_v57, %s2681_s5  ;;  %v2564_v57 = vld [vmem:[%s2769_s25 + $0x58] sm:$0xfe]   ;;  %v2565_v61 = vld [vmem:[%s2769_s25 + $0x50] sm:$0xfe]  }
  0x97   : > { %v1125_v1 = vpop.permute.xlu0 %1124  ;;  %v1118_v3 = vrot.slane %v2565_v61, 1 }
  0x98   : > { %1173 = vst.msk [vmem:[#allocation2] sm:$0x7f] %vm1172_vm5, %v1125_v1  ;;  %v1305_v2 = vpop.permute.xlu1 %1304 }
  0x99   : > { %1346 = vst.msk [vmem:[#allocation2 + $0x8] sm:$0xfe] %vm1344_vm6, %v1305_v2  ;;  %581 = vrot.lane.b32.xlu0 %v561_v62, %s2681_s5  ;;  %v1119_v62 = vrot.slane %v2564_v57, 1  ;;  %v2605_v2 = vld [vmem:[%s2769_s25 + $0x50] sm:$0x7f]   ;;  %v1300_v57 = vrot.slane %v2586_v51, 7 }
  0x9a   : > { %772 = vrot.lane.b32.xlu1 %v747_v0, %s2675_s27 }
  0x9b   : > { %v1303_v6 = vpop.permute.xlu0 %1302 }
  0x9c   : > { %1345 = vst.msk [vmem:[#allocation2] sm:$0xfe] %vm1344_vm6, %v1303_v6  ;;  %v1460_v8 = vpop.permute.xlu1 %1459  ;;  %v268_v6 = vrot.slane %v2605_v2, 7 }
  0x9d   : > { %1501 = vst.msk [vmem:[#allocation2 + $0x8] sm:$0xff] %vm1499_vm7, %v1460_v8  ;;  %770 = vrot.lane.b32.xlu0 %v746_v4, %s2675_s27  ;;  %v2568_v4 = vld [vmem:[%s2769_s25 + $0x60] sm:$0x7f]  }
  0x9e   : > { %949 = vrot.lane.b32.xlu1 %v2540_v5, %s2674_s26  ;;  %v1299_v5 = vrot.slane %v2567_v63, 7  ;;  %298 = vst.msk [vmem:[#allocation2 + $0x60] sm:$0xfe] %vm287_vm1, %v268_v6  ;;  %v1298_v10 = vrot.slane %v2568_v4, 7 }
  0x9f   : > { %v1458_v12 = vpop.permute.xlu0 %1457 }
  0xa0   : > { %1500 = vst.msk [vmem:[#allocation2] sm:$0xff] %vm1499_vm7, %v1458_v12  ;;  %v401_v14 = vpop.permute.xlu1 %400 }
  0xa1   : > { %947 = vrot.lane.b32.xlu0 %v2541_v7, %s2674_s26  ;;  %443 = vst.msk [vmem:[#allocation2 + $0x10] sm:$0xff] %vm442_vm8, %v401_v14 }
  0xa2   : > { %1142 = vrot.lane.b32.xlu1 %v1117_v9, %s2676_s28  ;;  %v2606_v9 = vld [vmem:[%s2769_s25 + $0x58] sm:$0x7f]  }
  0xa3   : > { %v1627_v19 = vpop.permute.xlu0 %1626  ;;  %v269_v12 = vrot.slane %v2606_v9, 7 }
  0xa4   : > { %1669 = vst.msk [vmem:[#allocation2] sm:$0x7f] %vm1668_vm9, %v1627_v19  ;;  %v403_v21 = vpop.permute.xlu1 %402 }
  0xa5   : > { %1140 = vrot.lane.b32.xlu0 %v1116_v15, %s2676_s28  ;;  %444 = vst.msk [vmem:[#allocation2 + $0x18] sm:$0xff] %vm442_vm8, %v403_v21  ;;  %v2570_v15 = vld [vmem:[%s2769_s25 + $0x60] sm:$0xff]   ;;  %v1622_v21 = vrot.slane %v2572_v16, 1 }
  0xa6   : > { %1320 = vrot.lane.b32.xlu1 %v1297_v18, %s2677_s29  ;;  %299 = vst.msk [vmem:[#allocation2 + $0x68] sm:$0xfe] %vm287_vm1, %v269_v12  ;;  %v2592_v12 = vld [vmem:[%s2769_s25 + $0x60] sm:$0xff]  }
  0xa7   : > { %v1629_v28 = vpop.permute.xlu0 %1628 }
  0xa8   : > { %1670 = vst.msk [vmem:[#allocation2 + $0x8] sm:$0x7f] %vm1668_vm9, %v1629_v28  ;;  %v572_v30 = vpop.permute.xlu1 %571  ;;  %v1623_v28 = vrot.slane %v2574_v22, 1 }
  0xa9   : > { %1318 = vrot.lane.b32.xlu0 %v1296_v23, %s2677_s29  ;;  %613 = vst.msk [vmem:[#allocation2 + $0x18] sm:$0x7f] %vm611_vm10, %v572_v30  ;;  %v2573_v23 = vld [vmem:[%s2769_s25 + $0x58] sm:$0xff]   ;;  %v566_v30 = vrot.slane %v2575_v24, 1 }
  0xaa   : > { %1475 = vrot.lane.b32.xlu1 %v2550_v26, %s2678_s30  ;;  %v2597_v24 = vld [vmem:[%s2769_s25 + $0x78] sm:$0xff]  }
  0xab   : > { %v570_v34 = vpop.permute.xlu0 %569  ;;  %v1683_v35 = vld [vmem:[#allocation2] sm:$0xff] }
  0xac   : > { %612 = vst.msk [vmem:[#allocation2 + $0x10] sm:$0x7f] %vm611_vm10, %v570_v34  ;;  %2386 = vmatprep.mubr.msk.bf16.mxu0 %vm143_vm0, %v1683_v35  ;;  %v761_v36 = vpop.permute.xlu1 %760  ;;  %v565_v34 = vrot.slane %v2576_v29, 1  ;;  %v2578_v35 = vld [vmem:[%s2769_s25 + $0x60] sm:$0x7f]  }
  0xad   : > { %1473 = vrot.lane.b32.xlu0 %v2552_v31, %s2678_s30  ;;  %806 = vst.msk [vmem:[#allocation2 + $0x18] sm:$0xfe] %vm802_vm3, %v761_v36  ;;  %v2577_v31 = vld [vmem:[%s2769_s25 + $0x68] sm:$0x7f]   ;;  %v2601_v29 = vld [vmem:[%s2769_s25 + $0x70] sm:$0xfe]  }
  0xae   : > { %416 = vrot.lane.b32.xlu1 %v2553_v33, %s2679_s3  ;;  %v751_v36 = vrot.slane %v2577_v31, 7 }
  0xaf   : > { %v759_v41 = vpop.permute.xlu0 %758  ;;  %v1684_v42 = vld [vmem:[#allocation2 + $0x8] sm:$0xff] }
  0xb0   : > { %805 = vst.msk [vmem:[#allocation2 + $0x10] sm:$0xfe] %vm802_vm3, %v759_v41  ;;  %2387 = vmatmul.mubr.msk.bf16.vlgmr.msra.gmra.mrb[0].mxu0 %vm143_vm0, %v1684_v42  ;;  %v938_v43 = vpop.permute.xlu1 %937  ;;  %v2582_v41 = vld [vmem:[%s2769_s25 + $0x68] sm:$0xfe]  }
  0xb1   : > { %1642 = vrot.lane.b32.xlu0 %v1620_v37, %s2680_s4  ;;  %983 = vst.msk [vmem:[#allocation2 + $0x18] sm:$0xff] %vm979_vm4, %v938_v43 }
  0xb2   : > { %418 = vrot.lane.b32.xlu1 %v2555_v39, %s2679_s3  ;;  %v750_v39 = vrot.slane %v2578_v35, 7 }
  0xb3   : > { %v936_v48 = vpop.permute.xlu0 %935 }
  0xb4   : > { %982 = vst.msk [vmem:[#allocation2 + $0x10] sm:$0xff] %vm979_vm4, %v936_v48  ;;  %v1131_v49 = vpop.permute.xlu1 %1130 }
  0xb5   : > { %1644 = vrot.lane.b32.xlu0 %v1621_v44, %s2680_s4  ;;  %1176 = vst.msk [vmem:[#allocation2 + $0x18] sm:$0x7f] %vm1172_vm5, %v1131_v49  ;;  %v2580_v44 = vld [vmem:[%s2769_s25 + $0x60] sm:$0xff]  }
  0xb6   : > { %587 = vrot.lane.b32.xlu1 %v564_v46, %s2681_s5  ;;  %v1121_v46 = vrot.slane %v2582_v41, 1 }
  0xb7   : > { %v1129_v53 = vpop.permute.xlu0 %1128 }
  0xb8   : > { %1175 = vst.msk [vmem:[#allocation2 + $0x10] sm:$0x7f] %vm1172_vm5, %v1129_v53  ;;  %v1309_v54 = vpop.permute.xlu1 %1308 }
  0xb9   : > { %585 = vrot.lane.b32.xlu0 %v563_v50, %s2681_s5  ;;  %1348 = vst.msk [vmem:[#allocation2 + $0x18] sm:$0xfe] %vm1344_vm6, %v1309_v54  ;;  %v1120_v50 = vrot.slane %v2583_v45, 1  ;;  %v2608_v54 = vld [vmem:[%s2769_s25 + $0x60] sm:$0x7f]  }
  0xba   : > { %776 = vrot.lane.b32.xlu1 %v749_v52, %s2675_s27  ;;  %v1301_v52 = vrot.slane %v2585_v47, 7 }
  0xbb   : > { %v1307_v58 = vpop.permute.xlu0 %1306 }
  0xbc   : > { %1347 = vst.msk [vmem:[#allocation2 + $0x10] sm:$0xfe] %vm1344_vm6, %v1307_v58  ;;  %v1464_v59 = vpop.permute.xlu1 %1463  ;;  %v270_v58 = vrot.slane %v2608_v54, 7 }
  0xbd   : > { %774 = vrot.lane.b32.xlu0 %v748_v55, %s2675_s27  ;;  %1503 = vst.msk [vmem:[#allocation2 + $0x18] sm:$0xff] %vm1499_vm7, %v1464_v59  ;;  %v2587_v59 = vld [vmem:[%s2769_s25 + $0x78] sm:$0xff]  }
  0xbe   : > { %953 = vrot.lane.b32.xlu1 %v2561_v56, %s2674_s26  ;;  %v2607_v56 = vld [vmem:[%s2769_s25 + $0x68] sm:$0x7f]   ;;  %300 = vst.msk [vmem:[#allocation2 + $0x70] sm:$0xfe] %vm287_vm1, %v270_v58 }
  0xbf   : > { %v1462_v0 = vpop.permute.xlu0 %1461  ;;  %v271_v61 = vrot.slane %v2607_v56, 7 }
  0xc0   : > { %1502 = vst.msk [vmem:[#allocation2 + $0x10] sm:$0xff] %vm1499_vm7, %v1462_v0  ;;  %v405_v1 = vpop.permute.xlu1 %404  ;;  %v2588_v0 = vld [vmem:[%s2769_s25 + $0x70] sm:$0xff]  }
  0xc1   : > { %951 = vrot.lane.b32.xlu0 %v2562_v60, %s2674_s26  ;;  %445 = vst.msk [vmem:[#allocation2 + $0x20] sm:$0xff] %vm442_vm8, %v405_v1  ;;  %v2589_v60 = vld [vmem:[%s2769_s25 + $0x78] sm:$0xfe]   ;;  %v2590_v1 = vld [vmem:[%s2769_s25 + $0x70] sm:$0xfe]  }
  0xc2   : > { %1146 = vrot.lane.b32.xlu1 %v1119_v62, %s2676_s28  ;;  %301 = vst.msk [vmem:[#allocation2 + $0x78] sm:$0xfe] %vm287_vm1, %v271_v61  ;;  %v1625_v2 = vrot.slane %v2589_v60, 1  ;;  %v1624_v6 = vrot.slane %v2590_v1, 1 }
  0xc3   : > { %v1631_v7 = vpop.permute.xlu0 %1630 }
  0xc4   : > { %1671 = vst.msk [vmem:[#allocation2 + $0x10] sm:$0x7f] %vm1668_vm9, %v1631_v7  ;;  %v407_v8 = vpop.permute.xlu1 %406  ;;  %v2591_v7 = vld [vmem:[%s2769_s25 + $0x68] sm:$0xff]  }
  0xc5   : > { %1144 = vrot.lane.b32.xlu0 %v1118_v3, %s2676_s28  ;;  %446 = vst.msk [vmem:[#allocation2 + $0x28] sm:$0xff] %vm442_vm8, %v407_v8  ;;  %v2593_v8 = vld [vmem:[%s2769_s25 + $0x68] sm:$0xfe]  }
  0xc6   : > { %1324 = vrot.lane.b32.xlu1 %v1299_v5, %s2677_s29 }
  0xc7   : > { %v1633_v13 = vpop.permute.xlu0 %1632 }
  0xc8   : > { %1672 = vst.msk [vmem:[#allocation2 + $0x18] sm:$0x7f] %vm1668_vm9, %v1633_v13  ;;  %v576_v14 = vpop.permute.xlu1 %575  ;;  %v2594_v13 = vld [vmem:[%s2769_s25 + $0x60] sm:$0xfe]  }
  0xc9   : > { %1322 = vrot.lane.b32.xlu0 %v1298_v10, %s2677_s29  ;;  %615 = vst.msk [vmem:[#allocation2 + $0x28] sm:$0x7f] %vm611_vm10, %v576_v14  ;;  %v568_v14 = vrot.slane %v2593_v8, 1 }
  0xca   : > { %1479 = vrot.lane.b32.xlu1 %v2569_v11, %s2678_s30 }
  0xcb   : > { %v574_v18 = vpop.permute.xlu0 %573  ;;  %v1685_v19 = vld [vmem:[#allocation2 + $0x10] sm:$0xff] }
  0xcc   : > { %614 = vst.msk [vmem:[#allocation2 + $0x20] sm:$0x7f] %vm611_vm10, %v574_v18  ;;  %2390 = vmatprep.mubr.msk.bf16.mxu0 %vm143_vm0, %v1685_v19  ;;  %v765_v20 = vpop.permute.xlu1 %764  ;;  %v567_v18 = vrot.slane %v2594_v13, 1  ;;  %v2596_v19 = vld [vmem:[%s2769_s25 + $0x70] sm:$0x7f]  }
  0xcd   : > { %1477 = vrot.lane.b32.xlu0 %v2570_v15, %s2678_s30  ;;  %808 = vst.msk [vmem:[#allocation2 + $0x28] sm:$0xfe] %vm802_vm3, %v765_v20  ;;  %v2595_v15 = vld [vmem:[%s2769_s25 + $0x78] sm:$0x7f]  }
  0xce   : > { %420 = vrot.lane.b32.xlu1 %v2571_v17, %s2679_s3  ;;  %v753_v20 = vrot.slane %v2595_v15, 7 }
  0xcf   : > { %v763_v25 = vpop.permute.xlu0 %762  ;;  %v1686_v26 = vld [vmem:[#allocation2 + $0x18] sm:$0xff] }
  0xd0   : > { %807 = vst.msk [vmem:[#allocation2 + $0x20] sm:$0xfe] %vm802_vm3, %v763_v25  ;;  %2391 = vmatmul.mubr.msk.bf16.gmra.mrb[4].mxu0 %vm143_vm0, %v1686_v26  ;;  %v942_v27 = vpop.permute.xlu1 %941  ;;  %v2600_v25 = vld [vmem:[%s2769_s25 + $0x78] sm:$0xfe]  }
  0xd1   : > { %1646 = vrot.lane.b32.xlu0 %v1622_v21, %s2680_s4  ;;  %985 = vst.msk [vmem:[#allocation2 + $0x28] sm:$0xff] %vm979_vm4, %v942_v27 }
  0xd2   : > { %422 = vrot.lane.b32.xlu1 %v2573_v23, %s2679_s3  ;;  %v752_v23 = vrot.slane %v2596_v19, 7 }
  0xd3   : > { %v940_v32 = vpop.permute.xlu0 %939 }
  0xd4   : > { %984 = vst.msk [vmem:[#allocation2 + $0x20] sm:$0xff] %vm979_vm4, %v940_v32  ;;  %v1135_v33 = vpop.permute.xlu1 %1134 }
  0xd5   : > { %1648 = vrot.lane.b32.xlu0 %v1623_v28, %s2680_s4  ;;  %1178 = vst.msk [vmem:[#allocation2 + $0x28] sm:$0x7f] %vm1172_vm5, %v1135_v33  ;;  %v2598_v28 = vld [vmem:[%s2769_s25 + $0x70] sm:$0xff]   ;;  %v1122_v33 = vrot.slane %v2601_v29, 1  ;;  %s2055_s25 = sshll.u32 %s136_s24, 4  ;;  %s3185_s25 = int_to_ptr.vmem [resolvable:$true] %s2055_s25 }
  0xd6   : > { %591 = vrot.lane.b32.xlu1 %v566_v30, %s2681_s5  ;;  %v1123_v30 = vrot.slane %v2600_v25, 1 }
  0xd7   : > { %v1133_v37 = vpop.permute.xlu0 %1132 }
  0xd8   : > { %1177 = vst.msk [vmem:[#allocation2 + $0x20] sm:$0x7f] %vm1172_vm5, %v1133_v37  ;;  %v1313_v38 = vpop.permute.xlu1 %1312 }
  0xd9   : > { %589 = vrot.lane.b32.xlu0 %v565_v34, %s2681_s5  ;;  %1350 = vst.msk [vmem:[#allocation2 + $0x28] sm:$0xfe] %vm1344_vm6, %v1313_v38 }
  0xda   : > { %780 = vrot.lane.b32.xlu1 %v751_v36, %s2675_s27 }
  0xdb   : > { %v1311_v42 = vpop.permute.xlu0 %1310 }
  0xdc   : > { %1349 = vst.msk [vmem:[#allocation2 + $0x20] sm:$0xfe] %vm1344_vm6, %v1311_v42  ;;  %v1468_v43 = vpop.permute.xlu1 %1467 }
  0xdd   : > { %778 = vrot.lane.b32.xlu0 %v750_v39, %s2675_s27  ;;  %1505 = vst.msk [vmem:[#allocation2 + $0x28] sm:$0xff] %vm1499_vm7, %v1468_v43 }
  0xde   : > { %957 = vrot.lane.b32.xlu1 %v2579_v40, %s2674_s26 }
  0xdf   : > { %v1466_v48 = vpop.permute.xlu0 %1465 }
  0xe0   : > { %1504 = vst.msk [vmem:[#allocation2 + $0x20] sm:$0xff] %vm1499_vm7, %v1466_v48  ;;  %v409_v49 = vpop.permute.xlu1 %408 }
  0xe1   : > { %955 = vrot.lane.b32.xlu0 %v2580_v44, %s2674_s26  ;;  %447 = vst.msk [vmem:[#allocation2 + $0x30] sm:$0xff] %vm442_vm8, %v409_v49 }
  0xe2   : > { %1150 = vrot.lane.b32.xlu1 %v1121_v46, %s2676_s28 }
  0xe3   : > { %v1635_v53 = vpop.permute.xlu0 %1634 }
  0xe4   : > { %1673 = vst.msk [vmem:[#allocation2 + $0x20] sm:$0x7f] %vm1668_vm9, %v1635_v53  ;;  %v411_v55 = vpop.permute.xlu1 %410 }
  0xe5   : > { %1148 = vrot.lane.b32.xlu0 %v1120_v50, %s2676_s28  ;;  %448 = vst.msk [vmem:[#allocation2 + $0x38] sm:$0xff] %vm442_vm8, %v411_v55 }
  0xe6   : > { %1328 = vrot.lane.b32.xlu1 %v1301_v52, %s2677_s29 }
  0xe7   : > { %v1637_v62 = vpop.permute.xlu0 %1636 }
  0xe8   : > { %1674 = vst.msk [vmem:[#allocation2 + $0x28] sm:$0x7f] %vm1668_vm9, %v1637_v62  ;;  %v580_v63 = vpop.permute.xlu1 %579 }
  0xe9   : > { %1326 = vrot.lane.b32.xlu0 %v1300_v57, %s2677_s29  ;;  %617 = vst.msk [vmem:[#allocation2 + $0x38] sm:$0x7f] %vm611_vm10, %v580_v63  ;;  %s2042_s29 = scalar_lea.sflag [#allocation4], %s134_s21 }
  0xea   : > { %1483 = vrot.lane.b32.xlu1 %v2587_v59, %s2678_s30 }
  0xeb   : > { %v578_v3 = vpop.permute.xlu0 %577  ;;  %v1687_v4 = vld [vmem:[#allocation2 + $0x20] sm:$0xff] }
  0xec   : > { %616 = vst.msk [vmem:[#allocation2 + $0x30] sm:$0x7f] %vm611_vm10, %v578_v3  ;;  %2394 = vmatprep.mubr.msk.bf16.mxu0 %vm143_vm0, %v1687_v4  ;;  %v769_v5 = vpop.permute.xlu1 %768 }
  0xed   : > { %1481 = vrot.lane.b32.xlu0 %v2588_v0, %s2678_s30  ;;  %810 = vst.msk [vmem:[#allocation2 + $0x38] sm:$0xfe] %vm802_vm3, %v769_v5  ;;  %s2609_s30 = scalar_lea.vmem %s3185_s25, 32 }
  0xee   : > { %1652 = vrot.lane.b32.xlu1 %v1625_v2, %s2680_s4  ;;  %p2610_p11 = scmp.ne.s32.totalorder %s3185_s25, %s2609_s30 }
  0xef   : > { %v767_v9 = vpop.permute.xlu0 %766  ;;  %v1688_v10 = vld [vmem:[#allocation2 + $0x28] sm:$0xff] }
  0xf0   : > { %809 = vst.msk [vmem:[#allocation2 + $0x30] sm:$0xfe] %vm802_vm3, %v767_v9  ;;  %2395 = vmatmul.mubr.msk.bf16.gmra.mrb[8].mxu0 %vm143_vm0, %v1688_v10  ;;  %v946_v11 = vpop.permute.xlu1 %945  ;;  %p2611_p12 = pnand %p2610_p11, %p2736_p5 }
  0xf1   : > { %1650 = vrot.lane.b32.xlu0 %v1624_v6, %s2680_s4  ;;  %987 = vst.msk [vmem:[#allocation2 + $0x38] sm:$0xff] %vm979_vm4, %v946_v11 }
  0xf2   : > { %426 = vrot.lane.b32.xlu1 %v2591_v7, %s2679_s3  ;;  %p2612_p13 = pneg %p2611_p12 }
  0xf3   : > { %v944_v16 = vpop.permute.xlu0 %943 }
  0xf4   : > { %986 = vst.msk [vmem:[#allocation2 + $0x30] sm:$0xff] %vm979_vm4, %v944_v16  ;;  %v1139_v17 = vpop.permute.xlu1 %1138 }
  0xf5   : > { %424 = vrot.lane.b32.xlu0 %v2592_v12, %s2679_s3  ;;  %1180 = vst.msk [vmem:[#allocation2 + $0x38] sm:$0x7f] %vm1172_vm5, %v1139_v17  ;;  %s2613_s3 = sshll.u32 %s2682_s13, 4  ;;  %s2614_s3 = int_to_ptr.vmem [resolvable:$false] %s2613_s3 }
  0xf6   : > { %595 = vrot.lane.b32.xlu1 %v568_v14, %s2681_s5  ;;  %s2615_s4 = scalar_lea.vmem %s2614_s3, 64  ;;  %p2616_p0 = scmp.lt.s32.totalorder %s3185_s25, %s2614_s3 }
  0xf7   : > { %v1137_v21 = vpop.permute.xlu0 %1136  ;;  %p2617_p1 = scmp.lt.s32.totalorder %s2615_s4, %s2609_s30 }
  0xf8   : > { %1179 = vst.msk [vmem:[#allocation2 + $0x30] sm:$0x7f] %vm1172_vm5, %v1137_v21  ;;  %v1317_v22 = vpop.permute.xlu1 %1316 }
  0xf9   : > { %593 = vrot.lane.b32.xlu0 %v567_v18, %s2681_s5  ;;  %1352 = vst.msk [vmem:[#allocation2 + $0x38] sm:$0xfe] %vm1344_vm6, %v1317_v22  ;;  %p2618_p2 = por %p2617_p1, %p2616_p0 }
  0xfa   : > { %784 = vrot.lane.b32.xlu1 %v753_v20, %s2675_s27 }
  0xfb   : > { %v1315_v26 = vpop.permute.xlu0 %1314  ;;  %p2619_p3 = pnand %p2618_p2, %p2612_p13 }
  0xfc   : > { %1351 = vst.msk [vmem:[#allocation2 + $0x30] sm:$0xfe] %vm1344_vm6, %v1315_v26  ;;  %v1472_v27 = vpop.permute.xlu1 %1471 }
  0xfd   : > { %782 = vrot.lane.b32.xlu0 %v752_v23, %s2675_s27  ;;  %1507 = vst.msk [vmem:[#allocation2 + $0x38] sm:$0xff] %vm1499_vm7, %v1472_v27 }
  0xfe   : > { %961 = vrot.lane.b32.xlu1 %v2597_v24, %s2674_s26 }
  0xff   : > { %v1470_v31 = vpop.permute.xlu0 %1469 }
 0x100   : > { %1506 = vst.msk [vmem:[#allocation2 + $0x30] sm:$0xff] %vm1499_vm7, %v1470_v31  ;;  %v413_v32 = vpop.permute.xlu1 %412 }
 0x101   : > { %959 = vrot.lane.b32.xlu0 %v2598_v28, %s2674_s26  ;;  %449 = vst.msk [vmem:[#allocation2 + $0x40] sm:$0xff] %vm442_vm8, %v413_v32 }
 0x102   : > { %1154 = vrot.lane.b32.xlu1 %v1123_v30, %s2676_s28 }
 0x103   : > { %v1639_v34 = vpop.permute.xlu0 %1638 }
 0x104   : > { %1675 = vst.msk [vmem:[#allocation2 + $0x30] sm:$0x7f] %vm1668_vm9, %v1639_v34  ;;  %v415_v35 = vpop.permute.xlu1 %414 }
 0x105   : > { %1152 = vrot.lane.b32.xlu0 %v1122_v33, %s2676_s28  ;;  %450 = vst.msk [vmem:[#allocation2 + $0x48] sm:$0xff] %vm442_vm8, %v415_v35  ;;  %s3183_s28 = scalar_lea.hbm %s3227_s2, %s2357_s23 }
 0x107   : > { %v1641_v36 = vpop.permute.xlu0 %1640 }
 0x108   : > { %1676 = vst.msk [vmem:[#allocation2 + $0x38] sm:$0x7f] %vm1668_vm9, %v1641_v36  ;;  %v584_v37 = vpop.permute.xlu1 %583 }
 0x109   : > { %619 = vst.msk [vmem:[#allocation2 + $0x48] sm:$0x7f] %vm611_vm10, %v584_v37 }
 0x10b   : > { %v582_v38 = vpop.permute.xlu0 %581  ;;  %v1689_v39 = vld [vmem:[#allocation2 + $0x30] sm:$0xff] }
 0x10c   : > { %618 = vst.msk [vmem:[#allocation2 + $0x40] sm:$0x7f] %vm611_vm10, %v582_v38  ;;  %2398 = vmatprep.mubr.msk.bf16.mxu0 %vm143_vm0, %v1689_v39  ;;  %v773_v40 = vpop.permute.xlu1 %772 }
 0x10d   : > { %812 = vst.msk [vmem:[#allocation2 + $0x48] sm:$0xfe] %vm802_vm3, %v773_v40 }
 0x10f   : > { %v771_v41 = vpop.permute.xlu0 %770  ;;  %v1690_v42 = vld [vmem:[#allocation2 + $0x38] sm:$0xff] }
 0x110   : > { %811 = vst.msk [vmem:[#allocation2 + $0x40] sm:$0xfe] %vm802_vm3, %v771_v41  ;;  %2399 = vmatmul.mubr.msk.bf16.gmra.mrb[12].mxu0 %vm143_vm0, %v1690_v42  ;;  %v950_v43 = vpop.permute.xlu1 %949 }
 0x111   : > { %989 = vst.msk [vmem:[#allocation2 + $0x48] sm:$0xff] %vm979_vm4, %v950_v43 }
 0x113   : > { %v948_v44 = vpop.permute.xlu0 %947 }
 0x114   : > { %988 = vst.msk [vmem:[#allocation2 + $0x40] sm:$0xff] %vm979_vm4, %v948_v44  ;;  %v1143_v45 = vpop.permute.xlu1 %1142 }
 0x115   : > { %1182 = vst.msk [vmem:[#allocation2 + $0x48] sm:$0x7f] %vm1172_vm5, %v1143_v45 }
 0x117   : > { %v1141_v46 = vpop.permute.xlu0 %1140 }
 0x118   : > { %1181 = vst.msk [vmem:[#allocation2 + $0x40] sm:$0x7f] %vm1172_vm5, %v1141_v46  ;;  %v1321_v47 = vpop.permute.xlu1 %1320 }
 0x119   : > { %1354 = vst.msk [vmem:[#allocation2 + $0x48] sm:$0xfe] %vm1344_vm6, %v1321_v47 }
 0x11b   : > { %v1319_v48 = vpop.permute.xlu0 %1318 }
 0x11c   : > { %1353 = vst.msk [vmem:[#allocation2 + $0x40] sm:$0xfe] %vm1344_vm6, %v1319_v48  ;;  %v1476_v49 = vpop.permute.xlu1 %1475 }
 0x11d   : > { %1509 = vst.msk [vmem:[#allocation2 + $0x48] sm:$0xff] %vm1499_vm7, %v1476_v49 }
 0x11f   : > { %v1474_v50 = vpop.permute.xlu0 %1473 }
 0x120   : > { %1508 = vst.msk [vmem:[#allocation2 + $0x40] sm:$0xff] %vm1499_vm7, %v1474_v50  ;;  %v417_v51 = vpop.permute.xlu1 %416 }
 0x121   : > { %451 = vst.msk [vmem:[#allocation2 + $0x50] sm:$0xff] %vm442_vm8, %v417_v51 }
 0x123   : > { %v1643_v52 = vpop.permute.xlu0 %1642 }
 0x124   : > { %1677 = vst.msk [vmem:[#allocation2 + $0x40] sm:$0x7f] %vm1668_vm9, %v1643_v52  ;;  %v419_v53 = vpop.permute.xlu1 %418 }
 0x125   : > { %452 = vst.msk [vmem:[#allocation2 + $0x58] sm:$0xff] %vm442_vm8, %v419_v53 }
 0x127   : > { %v1645_v54 = vpop.permute.xlu0 %1644 }
 0x128   : > { %1678 = vst.msk [vmem:[#allocation2 + $0x48] sm:$0x7f] %vm1668_vm9, %v1645_v54  ;;  %v588_v55 = vpop.permute.xlu1 %587 }
 0x129   : > { %621 = vst.msk [vmem:[#allocation2 + $0x58] sm:$0x7f] %vm611_vm10, %v588_v55 }
 0x12b   : > { %v586_v56 = vpop.permute.xlu0 %585  ;;  %v1691_v57 = vld [vmem:[#allocation2 + $0x40] sm:$0xff] }
 0x12c   : > { %620 = vst.msk [vmem:[#allocation2 + $0x50] sm:$0x7f] %vm611_vm10, %v586_v56  ;;  %2402 = vmatprep.mubr.msk.bf16.mxu1 %vm143_vm0, %v1691_v57  ;;  %v777_v58 = vpop.permute.xlu1 %776 }
 0x12d   : > { %814 = vst.msk [vmem:[#allocation2 + $0x58] sm:$0xfe] %vm802_vm3, %v777_v58 }
 0x12f   : > { %v775_v59 = vpop.permute.xlu0 %774  ;;  %v1692_v60 = vld [vmem:[#allocation2 + $0x48] sm:$0xff] }
 0x130   : > { %813 = vst.msk [vmem:[#allocation2 + $0x50] sm:$0xfe] %vm802_vm3, %v775_v59  ;;  %2403 = vmatmul.mubr.msk.bf16.vlgmr.msra.gmra.mrb[0].mxu1 %vm143_vm0, %v1692_v60  ;;  %v954_v61 = vpop.permute.xlu1 %953 }
 0x131   : > { %991 = vst.msk [vmem:[#allocation2 + $0x58] sm:$0xff] %vm979_vm4, %v954_v61 }
 0x133   : > { %v952_v62 = vpop.permute.xlu0 %951 }
 0x134   : > { %990 = vst.msk [vmem:[#allocation2 + $0x50] sm:$0xff] %vm979_vm4, %v952_v62  ;;  %v1147_v63 = vpop.permute.xlu1 %1146 }
 0x135   : > { %1184 = vst.msk [vmem:[#allocation2 + $0x58] sm:$0x7f] %vm1172_vm5, %v1147_v63 }
 0x137   : > { %v1145_v0 = vpop.permute.xlu0 %1144 }
 0x138   : > { %1183 = vst.msk [vmem:[#allocation2 + $0x50] sm:$0x7f] %vm1172_vm5, %v1145_v0  ;;  %v1325_v1 = vpop.permute.xlu1 %1324 }
 0x139   : > { %1356 = vst.msk [vmem:[#allocation2 + $0x58] sm:$0xfe] %vm1344_vm6, %v1325_v1 }
 0x13b   : > { %v1323_v2 = vpop.permute.xlu0 %1322 }
 0x13c   : > { %1355 = vst.msk [vmem:[#allocation2 + $0x50] sm:$0xfe] %vm1344_vm6, %v1323_v2  ;;  %v1480_v3 = vpop.permute.xlu1 %1479 }
 0x13d   : > { %1511 = vst.msk [vmem:[#allocation2 + $0x58] sm:$0xff] %vm1499_vm7, %v1480_v3 }
 0x13f   : > { %v1478_v4 = vpop.permute.xlu0 %1477 }
 0x140   : > { %1510 = vst.msk [vmem:[#allocation2 + $0x50] sm:$0xff] %vm1499_vm7, %v1478_v4  ;;  %v421_v5 = vpop.permute.xlu1 %420 }
 0x141   : > { %453 = vst.msk [vmem:[#allocation2 + $0x60] sm:$0xff] %vm442_vm8, %v421_v5 }
 0x143   : > { %v1647_v6 = vpop.permute.xlu0 %1646 }
 0x144   : > { %1679 = vst.msk [vmem:[#allocation2 + $0x50] sm:$0x7f] %vm1668_vm9, %v1647_v6  ;;  %v423_v7 = vpop.permute.xlu1 %422 }
 0x145   : > { %454 = vst.msk [vmem:[#allocation2 + $0x68] sm:$0xff] %vm442_vm8, %v423_v7 }
 0x147   : > { %v1649_v8 = vpop.permute.xlu0 %1648 }
 0x148   : > { %1680 = vst.msk [vmem:[#allocation2 + $0x58] sm:$0x7f] %vm1668_vm9, %v1649_v8  ;;  %v592_v9 = vpop.permute.xlu1 %591 }
 0x149   : > { %623 = vst.msk [vmem:[#allocation2 + $0x68] sm:$0x7f] %vm611_vm10, %v592_v9 }
 0x14b   : > { %v590_v10 = vpop.permute.xlu0 %589  ;;  %v1693_v11 = vld [vmem:[#allocation2 + $0x50] sm:$0xff] }
 0x14c   : > { %622 = vst.msk [vmem:[#allocation2 + $0x60] sm:$0x7f] %vm611_vm10, %v590_v10  ;;  %2406 = vmatprep.mubr.msk.bf16.mxu1 %vm143_vm0, %v1693_v11  ;;  %v781_v12 = vpop.permute.xlu1 %780 }
 0x14d   : > { %816 = vst.msk [vmem:[#allocation2 + $0x68] sm:$0xfe] %vm802_vm3, %v781_v12 }
 0x14f   : > { %v779_v13 = vpop.permute.xlu0 %778  ;;  %v1694_v14 = vld [vmem:[#allocation2 + $0x58] sm:$0xff] }
 0x150   : > { %815 = vst.msk [vmem:[#allocation2 + $0x60] sm:$0xfe] %vm802_vm3, %v779_v13  ;;  %2407 = vmatmul.mubr.msk.bf16.gmra.mrb[4].mxu1 %vm143_vm0, %v1694_v14  ;;  %v958_v15 = vpop.permute.xlu1 %957 }
 0x151   : > { %993 = vst.msk [vmem:[#allocation2 + $0x68] sm:$0xff] %vm979_vm4, %v958_v15 }
 0x153   : > { %v956_v16 = vpop.permute.xlu0 %955 }
 0x154   : > { %992 = vst.msk [vmem:[#allocation2 + $0x60] sm:$0xff] %vm979_vm4, %v956_v16  ;;  %v1151_v17 = vpop.permute.xlu1 %1150 }
 0x155   : > { %1186 = vst.msk [vmem:[#allocation2 + $0x68] sm:$0x7f] %vm1172_vm5, %v1151_v17 }
 0x157   : > { %v1149_v18 = vpop.permute.xlu0 %1148 }
 0x158   : > { %1185 = vst.msk [vmem:[#allocation2 + $0x60] sm:$0x7f] %vm1172_vm5, %v1149_v18  ;;  %v1329_v19 = vpop.permute.xlu1 %1328 }
 0x159   : > { %1358 = vst.msk [vmem:[#allocation2 + $0x68] sm:$0xfe] %vm1344_vm6, %v1329_v19 }
 0x15b   : > { %v1327_v20 = vpop.permute.xlu0 %1326 }
 0x15c   : > { %1357 = vst.msk [vmem:[#allocation2 + $0x60] sm:$0xfe] %vm1344_vm6, %v1327_v20  ;;  %v1484_v21 = vpop.permute.xlu1 %1483 }
 0x15d   : > { %1513 = vst.msk [vmem:[#allocation2 + $0x68] sm:$0xff] %vm1499_vm7, %v1484_v21 }
 0x15f   : > { %v1482_v22 = vpop.permute.xlu0 %1481 }
 0x160   : > { %1512 = vst.msk [vmem:[#allocation2 + $0x60] sm:$0xff] %vm1499_vm7, %v1482_v22  ;;  %v1653_v23 = vpop.permute.xlu1 %1652 }
 0x161   : > { %1682 = vst.msk [vmem:[#allocation2 + $0x68] sm:$0x7f] %vm1668_vm9, %v1653_v23 }
 0x163   : > { %v1651_v24 = vpop.permute.xlu0 %1650 }
 0x164   : > { %1681 = vst.msk [vmem:[#allocation2 + $0x60] sm:$0x7f] %vm1668_vm9, %v1651_v24  ;;  %v427_v25 = vpop.permute.xlu1 %426 }
 0x165   : > { %456 = vst.msk [vmem:[#allocation2 + $0x78] sm:$0xff] %vm442_vm8, %v427_v25 }
 0x167   : > { %v425_v26 = vpop.permute.xlu0 %424 }
 0x168   : > { %455 = vst.msk [vmem:[#allocation2 + $0x70] sm:$0xff] %vm442_vm8, %v425_v26  ;;  %v596_v27 = vpop.permute.xlu1 %595  ;;  %v1696_v31 = vld [vmem:[#allocation2 + $0x68] sm:$0xff] }
 0x169   : > { %625 = vst.msk [vmem:[#allocation2 + $0x78] sm:$0x7f] %vm611_vm10, %v596_v27 }
 0x16b   : > { %v594_v28 = vpop.permute.xlu0 %593  ;;  %v1695_v29 = vld [vmem:[#allocation2 + $0x60] sm:$0xff] }
 0x16c   : > { %624 = vst.msk [vmem:[#allocation2 + $0x70] sm:$0x7f] %vm611_vm10, %v594_v28  ;;  %2410 = vmatprep.mubr.msk.bf16.mxu1 %vm143_vm0, %v1695_v29  ;;  %v785_v30 = vpop.permute.xlu1 %784 }
 0x16d   : > { %818 = vst.msk [vmem:[#allocation2 + $0x78] sm:$0xfe] %vm802_vm3, %v785_v30  ;;  %2411 = vmatmul.mubr.msk.bf16.gmra.mrb[8].mxu1 %vm143_vm0, %v1696_v31 }
 0x16f   : > { %v783_v32 = vpop.permute.xlu0 %782 }
 0x170   : > { %817 = vst.msk [vmem:[#allocation2 + $0x70] sm:$0xfe] %vm802_vm3, %v783_v32  ;;  %v962_v33 = vpop.permute.xlu1 %961 }
 0x171   : > { %995 = vst.msk [vmem:[#allocation2 + $0x78] sm:$0xff] %vm979_vm4, %v962_v33 }
 0x173   : > { %v960_v34 = vpop.permute.xlu0 %959 }
 0x174   : > { %994 = vst.msk [vmem:[#allocation2 + $0x70] sm:$0xff] %vm979_vm4, %v960_v34  ;;  %v1155_v35 = vpop.permute.xlu1 %1154 }
 0x175   : > { %1188 = vst.msk [vmem:[#allocation2 + $0x78] sm:$0x7f] %vm1172_vm5, %v1155_v35 }
 0x177   : > { %v1153_v36 = vpop.permute.xlu0 %1152 }
 0x178   : > { %1187 = vst.msk [vmem:[#allocation2 + $0x70] sm:$0x7f] %vm1172_vm5, %v1153_v36 }
 0x17c   : > { %v1698_v38 = vld [vmem:[#allocation2 + $0x78] sm:$0xff] }
 0x17f   : > { %v1697_v37 = vld [vmem:[#allocation2 + $0x70] sm:$0xff] }
 0x180   : > { %2414 = vmatprep.mubr.msk.bf16.mxu1 %vm143_vm0, %v1697_v37 }
 0x181   : > { %2415 = vmatmul.mubr.msk.bf16.gmra.mrb[12].mxu1 %vm143_vm0, %v1698_v38 }
 0x183   : > { %v2388_v39 = vpop.f32.mrb[0].mxu0 }
 0x184   : > { %v1805_v40 = vpop.f32.mrb[1].mxu0  ;;  %v1971_v46 = vmul.f32 %v2388_v39, %v2388_v39 }
 0x185   : > { %v2389_v41 = vpop.f32.mrb[2].mxu0  ;;  %v1969_v43 = vmul.f32 %v1805_v40, %v1805_v40 }
 0x186   : > { %v1808_v42 = vpop.f32.mrb[3].mxu0  ;;  %v1972_v49 = vmul.f32 %v2389_v41, %v2389_v41 }
 0x187   : > { %v1932_v44 = vadd.f32 %v1808_v42, %v1805_v40  ;;  %v1970_v45 = vmul.f32 %v1808_v42, %v1808_v42 }
 0x189   : > { %v1933_v47 = vadd.f32 %v2388_v39, %v1932_v44  ;;  %v2001_v48 = vadd.f32 %v1970_v45, %v1969_v43 }
 0x18b   : > { %v2002_v50 = vadd.f32 %v2001_v48, %v1971_v46  ;;  %v1934_v51 = vadd.f32 %v2389_v41, %v1933_v47 }
 0x18d   : > { %v2003_v52 = vadd.f32 %v2002_v50, %v1972_v49 }
 0x1a3   : > { %v2392_v53 = vpop.f32.mrb[4].mxu0 }
 0x1a4   : > { %v1821_v54 = vpop.f32.mrb[5].mxu0  ;;  %v1975_v62 = vmul.f32 %v2392_v53, %v2392_v53 }
 0x1a5   : > { %v1935_v55 = vadd.f32 %v1934_v51, %v1821_v54  ;;  %v1973_v56 = vmul.f32 %v1821_v54, %v1821_v54  ;;  %v2393_v57 = vpop.f32.mrb[6].mxu0 }
 0x1a6   : > { %v1824_v58 = vpop.f32.mrb[7].mxu0  ;;  %v1976_v1 = vmul.f32 %v2393_v57, %v2393_v57 }
 0x1a7   : > { %v2004_v59 = vadd.f32 %v2003_v52, %v1973_v56  ;;  %v1936_v60 = vadd.f32 %v1935_v55, %v1824_v58  ;;  %v1974_v61 = vmul.f32 %v1824_v58, %v1824_v58 }
 0x1a9   : > { %v1937_v63 = vadd.f32 %v2392_v53, %v1936_v60  ;;  %v2005_v0 = vadd.f32 %v2004_v59, %v1974_v61 }
 0x1ab   : > { %v2006_v2 = vadd.f32 %v2005_v0, %v1975_v62  ;;  %v1938_v3 = vadd.f32 %v2393_v57, %v1937_v63 }
 0x1ad   : > { %v2007_v4 = vadd.f32 %v2006_v2, %v1976_v1 }
 0x1c3   : > { %v2396_v5 = vpop.f32.mrb[8].mxu0 }
 0x1c4   : > { %v1837_v6 = vpop.f32.mrb[9].mxu0  ;;  %v1979_v14 = vmul.f32 %v2396_v5, %v2396_v5 }
 0x1c5   : > { %v1939_v7 = vadd.f32 %v1938_v3, %v1837_v6  ;;  %v1977_v8 = vmul.f32 %v1837_v6, %v1837_v6  ;;  %v2397_v9 = vpop.f32.mrb[10].mxu0 }
 0x1c6   : > { %v1840_v10 = vpop.f32.mrb[11].mxu0  ;;  %v1980_v17 = vmul.f32 %v2397_v9, %v2397_v9 }
 0x1c7   : > { %v2008_v11 = vadd.f32 %v2007_v4, %v1977_v8  ;;  %v1940_v12 = vadd.f32 %v1939_v7, %v1840_v10  ;;  %v1978_v13 = vmul.f32 %v1840_v10, %v1840_v10 }
 0x1c9   : > { %v1941_v15 = vadd.f32 %v2396_v5, %v1940_v12  ;;  %v2009_v16 = vadd.f32 %v2008_v11, %v1978_v13 }
 0x1cb   : > { %v2010_v18 = vadd.f32 %v2009_v16, %v1979_v14  ;;  %v1942_v19 = vadd.f32 %v2397_v9, %v1941_v15 }
 0x1cd   : > { %v2011_v20 = vadd.f32 %v2010_v18, %v1980_v17 }
 0x1e3   : > { %v2400_v21 = vpop.f32.mrb[12].mxu0 }
 0x1e4   : > { %v1853_v22 = vpop.f32.mrb[13].mxu0  ;;  %v1983_v30 = vmul.f32 %v2400_v21, %v2400_v21 }
 0x1e5   : > { %v1943_v23 = vadd.f32 %v1942_v19, %v1853_v22  ;;  %v1981_v24 = vmul.f32 %v1853_v22, %v1853_v22  ;;  %v2401_v25 = vpop.f32.mrb[14].mxu0 }
 0x1e6   : > { %v1856_v26 = vpop.f32.mrb[15].mxu0  ;;  %v1984_v33 = vmul.f32 %v2401_v25, %v2401_v25 }
 0x1e7   : > { %v2012_v27 = vadd.f32 %v2011_v20, %v1981_v24  ;;  %v1944_v28 = vadd.f32 %v1943_v23, %v1856_v26  ;;  %v1982_v29 = vmul.f32 %v1856_v26, %v1856_v26 }
 0x1e9   : > { %v1945_v31 = vadd.f32 %v2400_v21, %v1944_v28  ;;  %v2013_v32 = vadd.f32 %v2012_v27, %v1982_v29 }
 0x1eb   : > { %v2014_v34 = vadd.f32 %v2013_v32, %v1983_v30  ;;  %v1946_v35 = vadd.f32 %v2401_v25, %v1945_v31 }
 0x1ed   : > { %v2015_v36 = vadd.f32 %v2014_v34, %v1984_v33 }
 0x203   : > { %v2404_v37 = vpop.f32.mrb[0].mxu1 }
 0x204   : > { %v1869_v38 = vpop.f32.mrb[1].mxu1  ;;  %v1987_v46 = vmul.f32 %v2404_v37, %v2404_v37 }
 0x205   : > { %v1947_v39 = vadd.f32 %v1946_v35, %v1869_v38  ;;  %v1985_v40 = vmul.f32 %v1869_v38, %v1869_v38  ;;  %v2405_v41 = vpop.f32.mrb[2].mxu1 }
 0x206   : > { %v1872_v42 = vpop.f32.mrb[3].mxu1  ;;  %v1988_v49 = vmul.f32 %v2405_v41, %v2405_v41 }
 0x207   : > { %v2016_v43 = vadd.f32 %v2015_v36, %v1985_v40  ;;  %v1948_v44 = vadd.f32 %v1947_v39, %v1872_v42  ;;  %v1986_v45 = vmul.f32 %v1872_v42, %v1872_v42 }
 0x209   : > { %v1949_v47 = vadd.f32 %v2404_v37, %v1948_v44  ;;  %v2017_v48 = vadd.f32 %v2016_v43, %v1986_v45 }
 0x20b   : > { %v2018_v50 = vadd.f32 %v2017_v48, %v1987_v46  ;;  %v1950_v51 = vadd.f32 %v2405_v41, %v1949_v47 }
 0x20d   : > { %v2019_v52 = vadd.f32 %v2018_v50, %v1988_v49 }
 0x223   : > { %v2408_v53 = vpop.f32.mrb[4].mxu1 }
 0x224   : > { %v1885_v54 = vpop.f32.mrb[5].mxu1  ;;  %v1991_v62 = vmul.f32 %v2408_v53, %v2408_v53 }
 0x225   : > { %v1951_v55 = vadd.f32 %v1950_v51, %v1885_v54  ;;  %v1989_v56 = vmul.f32 %v1885_v54, %v1885_v54  ;;  %v2409_v57 = vpop.f32.mrb[6].mxu1 }
 0x226   : > { %v1888_v58 = vpop.f32.mrb[7].mxu1  ;;  %v1992_v1 = vmul.f32 %v2409_v57, %v2409_v57 }
 0x227   : > { %v2020_v59 = vadd.f32 %v2019_v52, %v1989_v56  ;;  %v1952_v60 = vadd.f32 %v1951_v55, %v1888_v58  ;;  %v1990_v61 = vmul.f32 %v1888_v58, %v1888_v58 }
 0x229   : > { %v1953_v63 = vadd.f32 %v2408_v53, %v1952_v60  ;;  %v2021_v0 = vadd.f32 %v2020_v59, %v1990_v61 }
 0x22b   : > { %v2022_v2 = vadd.f32 %v2021_v0, %v1991_v62  ;;  %v1954_v3 = vadd.f32 %v2409_v57, %v1953_v63 }
 0x22d   : > { %v2023_v4 = vadd.f32 %v2022_v2, %v1992_v1 }
 0x240   : > { %v2412_v5 = vpop.f32.mrb[8].mxu1 }
 0x241   : > { %v1901_v6 = vpop.f32.mrb[9].mxu1  ;;  %v1995_v14 = vmul.f32 %v2412_v5, %v2412_v5 }
 0x242   : > { %v1955_v7 = vadd.f32 %v1954_v3, %v1901_v6  ;;  %v1993_v8 = vmul.f32 %v1901_v6, %v1901_v6  ;;  %v2413_v9 = vpop.f32.mrb[10].mxu1 }
 0x243   : > { %v1904_v10 = vpop.f32.mrb[11].mxu1  ;;  %v1996_v17 = vmul.f32 %v2413_v9, %v2413_v9 }
 0x244   : > { %v2024_v11 = vadd.f32 %v2023_v4, %v1993_v8  ;;  %v1956_v12 = vadd.f32 %v1955_v7, %v1904_v10  ;;  %v1994_v13 = vmul.f32 %v1904_v10, %v1904_v10 }
 0x246   : > { %v1957_v15 = vadd.f32 %v2412_v5, %v1956_v12  ;;  %v2025_v16 = vadd.f32 %v2024_v11, %v1994_v13 }
 0x248   : > { %v2026_v18 = vadd.f32 %v2025_v16, %v1995_v14  ;;  %v1958_v19 = vadd.f32 %v2413_v9, %v1957_v15 }
 0x24a   : > { %v2027_v20 = vadd.f32 %v2026_v18, %v1996_v17 }
 0x254   : > { %v2416_v21 = vpop.f32.mrb[12].mxu1 }
 0x255   : > { %v1917_v22 = vpop.f32.mrb[13].mxu1  ;;  %v1999_v30 = vmul.f32 %v2416_v21, %v2416_v21 }
 0x256   : > { %v1959_v23 = vadd.f32 %v1958_v19, %v1917_v22  ;;  %v1997_v24 = vmul.f32 %v1917_v22, %v1917_v22  ;;  %v2417_v25 = vpop.f32.mrb[14].mxu1 }
 0x257   : > { %v1920_v26 = vpop.f32.mrb[15].mxu1  ;;  %v2000_v33 = vmul.f32 %v2417_v25, %v2417_v25 }
 0x258   : > { %v2028_v27 = vadd.f32 %v2027_v20, %v1997_v24  ;;  %v1960_v28 = vadd.f32 %v1959_v23, %v1920_v26  ;;  %v1998_v29 = vmul.f32 %v1920_v26, %v1920_v26 }
 0x25a   : > { %v1961_v31 = vadd.f32 %v2416_v21, %v1960_v28  ;;  %v2029_v32 = vadd.f32 %v2028_v27, %v1998_v29 }
 0x25c   : > { %v1962_v34 = vadd.f32 %v2417_v25, %v1961_v31  ;;  %v2030_v35 = vadd.f32 %v2029_v32, %v1999_v30 }
 0x25e   : > { %v1963_v36 = vrot.slane %v1962_v34, 4  ;;  %v2031_v37 = vadd.f32 %v2030_v35, %v2000_v33 }
 0x260   : > { %v1964_v38 = vadd.f32 %v1963_v36, %v1962_v34  ;;  %v2032_v39 = vrot.slane %v2031_v37, 4 }
 0x262   : > { %v1965_v40 = vrot.slane %v1964_v38, 2  ;;  %v2033_v41 = vadd.f32 %v2032_v39, %v2031_v37 }
 0x264   : > { %v1966_v42 = vadd.f32 %v1965_v40, %v1964_v38  ;;  %v2034_v43 = vrot.slane %v2033_v41, 2 }
 0x266   : > { %v1967_v44 = vrot.slane %v1966_v42, 1  ;;  %v2035_v45 = vadd.f32 %v2034_v43, %v2033_v41 }
 0x268   : > { %v2036_v46 = vrot.slane %v2035_v45, 1  ;;  %v1968_v47 = vadd.f32 %v1967_v44, %v1966_v42 }
 0x26a   : > { %v2037_v48 = vadd.f32 %v2036_v46, %v2035_v45 }
 0x26c   : > { %v2039_v49 = vsel %vm2038_vm11, %v1968_v47, %v2037_v48 }
 0x26d   : > { %2040 = vst [vmem:[%s136_s24] sm:$0x3] %v2039_v49 }
 0x26e   : > { %2622 = shalt.err (!%p2619_p3)
}
 0x26f   : > { %s2623_s5 = scalar_lea.hbm %s3183_s28, 32  ;;  %s2627_s8 = scalar_lea.hbm %s3227_s2, 64 }
 0x270   : > { %p2624_p4 = scmp.ne.s32.totalorder %s3183_s28, %s2623_s5  ;;  %p2628_p9 = scmp.lt.u32.totalorder %s3183_s28, %s3227_s2 }
 0x271   : > { %p2629_p10 = scmp.lt.u32.totalorder %s2627_s8, %s2623_s5  ;;  %p2631_p12 = scmp.lt.u32.totalorder %s2623_s5, %s3183_s28 }
 0x272   : > { %p2625_p7 = pnand %p2624_p4, %p2736_p5 }
 0x273   : > { %p2630_p11 = por %p2629_p10, %p2628_p9 }
 0x274   : > { %p2626_p8 = pneg %p2625_p7 }
 0x275   : > { %p2632_p13 = por %p2631_p12, %p2630_p11 }
 0x277   : > { %p2633_p0 = pnand %p2632_p13, %p2626_p8 }
 0x279   : > { %2636 = shalt.err (!%p2633_p0)
}
 0x27a   : > { %2426 = dma.vmem_to_hbm [thread:$0]  (%p2736_p5), %s3185_s25, 32, %s3183_s28, %s2042_s29  }
 0x27b PF: > { %p2432_p1 = scmp.ge.s32.totalorder %s2671_s12, 2  ;;  %s2067_s17 = sand.u32 1, %s2659_s9  }
 0x27c   : > { %s2068_s21 = scalar_lea.sflag [#allocation4], %s2067_s17 }
 0x27d   : > { %p2429_p2 = pnand %p2432_p1, %p2740_p6 }
 0x27f   : > { %2654 = dma.done.wait (!%p2429_p2), %s2068_s21, 32  }
 0x280   : > { %2656 = vsyncadd (!%p2429_p2), %s2068_s21, 4294967264  ;;  %p12_p3 = scmp.ge.s32.totalorder %s2723_s15, 4   ;;  %s3230_s9 = smov %s2663_s10 }
 0x281   : > { %s3231_s10 = smov %s2667_s11  ;;  %s3232_s11 = smov %s2734_s18 }
 0x282   : > { %s3233_s12 = smov %s2723_s15  ;;  %14 = sbr.rel (!%p12_p3) target bundleno = 3 (0x3), region = 65 }
 0x289   :  { %2073 = vsyncpa [#allocation4], 1 }
 0x28a   :  { %2075 = vsyncpa [#allocation4 + $0x1], 1 }

</bundles_post_ra>
